<compile_context>
chip_gen: v7x
topology: tpu7x:2x2x1
jax: 0.10.0
libtpu: 0.0.40
codegen_flags: <defaults>
</compile_context>

<pallas_src>
import functools

import jax
import jax.numpy as jnp
from jax import lax
from jax.experimental import pallas as pl
from jax.experimental.pallas import tpu as pltpu


def _round_up(n: int, m: int) -> int:
    return ((n + m - 1) // m) * m


def cluster_kernel(zq_ref, rzq_ref, zk_ref, rzk_ref,
                   wq1_ref, wq2_ref, wkv1_ref, wkv2_ref, wo_ref,
                   mu_ref, musq_ref,
                   x_ref, q_ref,
                   q_sc, acc_sc, m_sc, l_sc,
                   *, num_heads: int, alpha: float, z_dim: int,
                   n_valid: int, needs_mask: bool, kv_resident: bool, tk: int):
    Z = z_dim
    nh = num_heads
    hd = Z // nh
    j = pl.program_id(1)
    nk = pl.num_programs(1)

    # ---- init once per query tile: query projections + running stats -------
    @pl.when(j == 0)
    def _init():
        # 1/sqrt(hd) softmax scale is pre-folded into wq1/wq2 host-side.
        q_sc[0] = jnp.dot(zq_ref[...], wq1_ref[...],
                          preferred_element_type=jnp.float32)
        q_sc[1] = jnp.dot(rzq_ref[...], wq2_ref[...],
                          preferred_element_type=jnp.float32)
        acc_sc[...] = jnp.zeros(acc_sc.shape, jnp.float32)
        m_sc[...] = jnp.full(m_sc.shape, -jnp.inf, jnp.float32)
        l_sc[...] = jnp.zeros(l_sc.shape, jnp.float32)

    # ---- current KV rows (resident: slice the whole-N VMEM block) ----------
    if kv_resident:
        off = pl.multiple_of(j * tk, tk)
        zk = zk_ref[pl.ds(off, tk), :]
        rzk = rzk_ref[pl.ds(off, tk), :]
    else:
        zk = zk_ref[...]
        rzk = rzk_ref[...]

    # ---- fused K|V projections for this KV tile (width 2Z, not 2 x Z) ------
    kv1 = jnp.dot(rzk, wkv1_ref[...], preferred_element_type=jnp.float32)  # [K1|V1]
    kv2 = jnp.dot(zk, wkv2_ref[...], preferred_element_type=jnp.float32)   # [K2|V2]

    if needs_mask:
        # Single additive bias row per KV tile; finite -1e30 (not -inf) so a
        # heavily padded tile can never produce NaN in the rescale path.
        kv_idx = j * tk + lax.broadcasted_iota(jnp.int32, (1, tk), 1)
        bias = jnp.where(kv_idx < n_valid, 0.0, -1e30).astype(jnp.float32)

    contract_last = (((1,), (1,)), ((), ()))   # Q K^T without materializing K.T

    # Static unroll: 2 directions x num_heads online-softmax updates.
    for d, kv, q_full in ((0, kv1, q_sc[0]), (1, kv2, q_sc[1])):
        for h in range(nh):
            c = d * nh + h
            q_h = q_full[:, h * hd:(h + 1) * hd]
            k_h = kv[:, h * hd:(h + 1) * hd]
            v_h = kv[:, Z + h * hd:Z + (h + 1) * hd]
            s = lax.dot_general(q_h, k_h, contract_last,
                                preferred_element_type=jnp.float32)
            if needs_mask:
                s = s + bias
            m_prev = m_sc[c]
            m_new = jnp.maximum(m_prev, jnp.max(s, axis=-1, keepdims=True))
            corr = jnp.exp(m_prev - m_new)
            p = jnp.exp(s - m_new)
            l_sc[c] = corr * l_sc[c] + jnp.sum(p, axis=-1, keepdims=True)
            acc_sc[c] = corr * acc_sc[c] + jnp.dot(
                p, v_h, preferred_element_type=jnp.float32)
            m_sc[c] = m_new

    # ---- finalize at the last KV tile ---------------------------------------
    @pl.when(j == nk - 1)
    def _finalize():
        # Output projection: wo is block-diag(wo1, wo2); accumulate x directly
        # from per-(direction, head) slabs -- runs once per query tile, off
        # the hot KV loop.
        x = None
        for c in range(2 * nh):
            attn_c = acc_sc[c] * (1.0 / l_sc[c])                   # (TQ, hd)
            part = jnp.dot(attn_c, wo_ref[c * hd:(c + 1) * hd, :],
                           preferred_element_type=jnp.float32)     # (TQ, 2Z)
            x = part if x is None else x + part
        x_ref[...] = x.astype(x_ref.dtype)

        # Student-t soft assignment, matmul-form distance:
        #   d2 = ||x||^2 + ||mu||^2 - 2 x mu^T
        mu = mu_ref[...]
        xm = lax.dot_general(x, mu, contract_last,
                             preferred_element_type=jnp.float32)   # (TQ, K)
        x2 = jnp.sum(x * x, axis=-1, keepdims=True)                # (TQ, 1)
        d2 = jnp.maximum(x2 + musq_ref[...] - 2.0 * xm, 0.0)
        qv = 1.0 / (1.0 + d2 / alpha + 1e-8)
        expo = alpha + 1.0
        if float(expo).is_integer() and 1.0 <= expo <= 4.0:
            qp = qv
            for _ in range(int(expo) - 1):     # integer power -> multiplies
                qp = qp * qv
        else:
            qp = qv ** expo
        qp = qp * 0.5
        q_ref[...] = (qp / jnp.sum(qp, axis=-1, keepdims=True)).astype(q_ref.dtype)


class ClusterPallas:
    """JAX/Pallas port of stands.model.cluster.Cluster (forward pass)."""

    def __init__(self, key, use_image=True, z_dim=16, n_subtypes=2, alpha=1.0,
                 num_heads=2):
        self.subtypes = n_subtypes
        self.alpha = float(alpha)
        self.num_heads = num_heads
        self.z_dim = z_dim * 2 if use_image else z_dim      # latent dim Z
        Z = self.z_dim
        assert Z % num_heads == 0
        hd = Z // num_heads
        ks = jax.random.split(key, 9)
        sc = 1.0 / (Z ** 0.5)
        # Fusion (TFBlock stand-in) weights: two cross-attention directions.
        self.wq1 = jax.random.normal(ks[0], (Z, Z), jnp.float32) * sc
        self.wk1 = jax.random.normal(ks[1], (Z, Z), jnp.float32) * sc
        self.wv1 = jax.random.normal(ks[2], (Z, Z), jnp.float32) * sc
        self.wo1 = jax.random.normal(ks[3], (Z, Z), jnp.float32) * sc
        self.wq2 = jax.random.normal(ks[4], (Z, Z), jnp.float32) * sc
        self.wk2 = jax.random.normal(ks[5], (Z, Z), jnp.float32) * sc
        self.wv2 = jax.random.normal(ks[6], (Z, Z), jnp.float32) * sc
        self.wo2 = jax.random.normal(ks[7], (Z, Z), jnp.float32) * sc
        # mu: Parameter(subtypes, z_dim*2)
        self.mu = jax.random.normal(ks[8], (n_subtypes, 2 * Z), jnp.float32)
        # Kernel-side weights (built once, host-side):
        #   * softmax scale folded into the query projections,
        #   * K|V fused per direction, wo1/wo2 fused block-diagonally.
        scale = 1.0 / (hd ** 0.5)
        self.wq1_k = self.wq1 * scale
        self.wq2_k = self.wq2 * scale
        self.wkv1 = jnp.concatenate([self.wk1, self.wv1], axis=1)   # (Z, 2Z)
        self.wkv2 = jnp.concatenate([self.wk2, self.wv2], axis=1)   # (Z, 2Z)
        zeros = jnp.zeros((Z, Z), jnp.float32)
        self.wo_bd = jnp.concatenate(                               # (2Z, 2Z)
            [jnp.concatenate([self.wo1, zeros], axis=1),
             jnp.concatenate([zeros, self.wo2], axis=1)], axis=0)

    @staticmethod
    def _choose_tiles(n):
        # Query tiles: up to 512 rows; for small N split into >=2 tiles so the
        # "parallel" grid axis feeds both v7x TensorCores.
        if n <= 16:
            tq = 8
        elif n <= 1024:
            tq = _round_up(-(-n // 2), 8)
        else:
            tq = 512
        # KV/flash tiles: decoupled and larger to amortize per-grid-step
        # overhead (~0.35 us/step).
        tk = min(1024, _round_up(n, 8))
        return tq, tk

    def forward(self, z, res_z):
        N, Z = z.shape
        assert Z == self.z_dim
        D = 2 * Z
        K = self.subtypes
        nh = self.num_heads

        TQ, TK = self._choose_tiles(N)
        n_pad_q = _round_up(N, TQ)
        n_pad_kv = _round_up(N, TK)
        needs_mask = n_pad_kv != N

        def pad_rows(a, rows):
            if a.shape[0] == rows:
                return a
            return jnp.pad(a, ((0, rows - a.shape[0]), (0, 0)))

        # Query side and KV side are padded independently (TQ vs TK multiples).
        zq_p, rzq_p = pad_rows(z, n_pad_q), pad_rows(res_z, n_pad_q)
        zk_p, rzk_p = pad_rows(z, n_pad_kv), pad_rows(res_z, n_pad_kv)

        # Keep the whole KV side VMEM-resident when it fits comfortably
        # (2 arrays x 2 pipeline buffers); otherwise stream TK-row tiles.
        kv_resident = (2 * 2 * n_pad_kv * Z * 4) <= (24 << 20)

        musq = jnp.sum(self.mu * self.mu, axis=1, keepdims=True).T   # (1, K)

        kern = functools.partial(
            cluster_kernel, num_heads=nh, alpha=self.alpha, z_dim=Z,
            n_valid=N, needs_mask=needs_mask, kv_resident=kv_resident, tk=TK)

        qt = lambda bs: pl.BlockSpec(bs, lambda i, j: (i, 0))    # query-tiled
        res = lambda bs: pl.BlockSpec(bs, lambda i, j: (0, 0))   # resident
        if kv_resident:
            kv_spec = res((n_pad_kv, Z))
        else:
            kv_spec = pl.BlockSpec((TK, Z), lambda i, j: (j, 0))  # kv-streamed

        # VMEM budget: double-buffered blocks + scratch + (TQ,TK) intermediates.
        kv_blk_rows = n_pad_kv if kv_resident else TK
        vmem_est = 4 * (
            2 * 2 * TQ * Z                                   # zq / rzq blocks
            + 2 * 2 * kv_blk_rows * Z                        # zk / rzk blocks
            + 2 * (2 * Z * Z + 2 * Z * D + D * D + K * D + K)  # weights
            + 2 * (TQ * D + TQ * K)                          # outputs
            + (2 * TQ * Z + 2 * TQ * Z + 4 * nh * TQ)        # scratch
            + 3 * TQ * TK)                                   # score/prob temps
        vmem_limit = int(min(48 << 20, max(32 << 20, vmem_est + (4 << 20))))

        x_p, q_p = pl.pallas_call(
            kern,
            out_shape=(jax.ShapeDtypeStruct((n_pad_q, D), jnp.float32),
                       jax.ShapeDtypeStruct((n_pad_q, K), jnp.float32)),
            grid_spec=pltpu.PrefetchScalarGridSpec(
                num_scalar_prefetch=0,
                grid=(n_pad_q // TQ, n_pad_kv // TK),
                in_specs=[qt((TQ, Z)), qt((TQ, Z)),        # z, res_z (queries)
                          kv_spec, kv_spec,                # z, res_z (keys/values)
                          res((Z, Z)), res((Z, Z)),        # wq1*s, wq2*s
                          res((Z, D)), res((Z, D)),        # wkv1, wkv2 (fused K|V)
                          res((D, D)),                     # wo block-diag
                          res((K, D)), res((1, K))],       # mu, ||mu||^2
                out_specs=(pl.BlockSpec((TQ, D), lambda i, j: (i, 0)),
                           pl.BlockSpec((TQ, K), lambda i, j: (i, 0))),
                scratch_shapes=[
                    pltpu.VMEM((2, TQ, Z), jnp.float32),            # Q1 | Q2
                    pltpu.VMEM((2 * nh, TQ, Z // nh), jnp.float32), # acc per (dir, head)
                    pltpu.VMEM((2 * nh, TQ, 1), jnp.float32),       # running max
                    pltpu.VMEM((2 * nh, TQ, 1), jnp.float32),       # running denom
                ]),
            compiler_params=pltpu.CompilerParams(
                dimension_semantics=("parallel", "arbitrary"),
                vmem_limit_bytes=vmem_limit),
        )(zq_p, rzq_p, zk_p, rzk_p,
          self.wq1_k, self.wq2_k, self.wkv1, self.wkv2, self.wo_bd,
          self.mu, musq)

        x, q = x_p[:N], q_p[:N]
        # side-effecting centroid update (torch does this via pandas groupby)
        self.mu = self._mu_update(x, q, self.mu)
        return x, q

    @staticmethod
    def _mu_update(x, q, mu_old):
        y = jnp.argmax(q, axis=1)
        onehot = jax.nn.one_hot(y, q.shape[1], dtype=x.dtype)   # (N, K)
        counts = onehot.sum(axis=0)[:, None]                    # (K, 1)
        sums = onehot.T @ x                                     # (K, D)
        return jnp.where(counts > 0, sums / jnp.maximum(counts, 1.0), mu_old)


def _reference(model, z, res_z):
    """Pure-jnp reference of the same math for a correctness check."""
    def mha(q_in, kv_in, wq, wk, wv, wo):
        Q, K, V = q_in @ wq, kv_in @ wk, kv_in @ wv
        hd = Q.shape[-1] // model.num_heads
        outs = []
        for h in range(model.num_heads):
            Qh, Kh, Vh = (M[:, h * hd:(h + 1) * hd] for M in (Q, K, V))
            p = jax.nn.softmax(Qh @ Kh.T / (hd ** 0.5), axis=-1)
            outs.append(p @ Vh)
        return jnp.concatenate(outs, -1) @ wo
    x = jnp.concatenate([mha(z, res_z, model.wq1, model.wk1, model.wv1, model.wo1),
                         mha(res_z, z, model.wq2, model.wk2, model.wv2, model.wo2)], -1)
    d2 = jnp.sum((x[:, None, :] - model.mu[None, :, :]) ** 2, axis=2)
    q = 1.0 / (1.0 + d2 / model.alpha + 1e-8)
    q = q ** (model.alpha + 1.0) / 2.0
    q = q / jnp.sum(q, axis=1, keepdims=True)
    return x, q


if __name__ == "__main__":
    key = jax.random.PRNGKey(0)
    k_model, k_z, k_rz, k_z2, k_rz2, k_z3, k_rz3 = jax.random.split(key, 7)

    model = ClusterPallas(k_model, use_image=True, z_dim=16, n_subtypes=2,
                          alpha=1.0, num_heads=2)
    Z = model.z_dim                      # 32

    # ---- test 1: tile-aligned N (no KV masking path, single query tile) -----
    N = 8
    z = jax.random.normal(k_z, (N, Z), jnp.float32)
    res_z = jax.random.normal(k_rz, (N, Z), jnp.float32)
    x_ref, q_ref = _reference(model, z, res_z)   # before mu_update mutates model.mu
    x, q = model.forward(z, res_z)
    jax.block_until_ready((x, q, model.mu))
    assert x.shape == (N, 2 * Z) and q.shape == (N, model.subtypes)
    assert jnp.allclose(x, x_ref, rtol=1e-4, atol=1e-4)
    assert jnp.allclose(q, q_ref, rtol=1e-4, atol=1e-4)
    assert jnp.allclose(jnp.sum(q, axis=1), 1.0, atol=1e-5)

    # ---- test 2: ragged N (query padding + additive KV mask, 2 query tiles) -
    N2 = 12
    z2 = jax.random.normal(k_z2, (N2, Z), jnp.float32)
    res_z2 = jax.random.normal(k_rz2, (N2, Z), jnp.float32)
    x2_ref, q2_ref = _reference(model, z2, res_z2)
    x2, q2 = model.forward(z2, res_z2)
    jax.block_until_ready((x2, q2, model.mu))
    assert x2.shape == (N2, 2 * Z) and q2.shape == (N2, model.subtypes)
    assert jnp.allclose(x2, x2_ref, rtol=1e-4, atol=1e-4)
    assert jnp.allclose(q2, q2_ref, rtol=1e-4, atol=1e-4)

    # ---- test 3: multi KV-tile online softmax + resident KV + masking -------
    N3 = 1536
    z3 = jax.random.normal(k_z3, (N3, Z), jnp.float32)
    res_z3 = jax.random.normal(k_rz3, (N3, Z), jnp.float32)
    x3_ref, q3_ref = _reference(model, z3, res_z3)
    x3, q3 = model.forward(z3, res_z3)
    jax.block_until_ready((x3, q3, model.mu))
    assert x3.shape == (N3, 2 * Z) and q3.shape == (N3, model.subtypes)
    assert jnp.allclose(x3, x3_ref, rtol=1e-4, atol=1e-4)
    assert jnp.allclose(q3, q3_ref, rtol=1e-4, atol=1e-4)
    assert jnp.allclose(jnp.sum(q3, axis=1), 1.0, atol=1e-5)

    print("KERNEL_OK")
</pallas_src>

<mosaic_0001>
module attributes {stable_mosaic.version = 11 : i64} {
  func.func @cluster_kernel(%arg0: i32, %arg1: i32, %arg2: memref<8x32xf32, #tpu.memory_space<vmem>>, %arg3: memref<8x32xf32, #tpu.memory_space<vmem>>, %arg4: memref<8x32xf32, #tpu.memory_space<vmem>>, %arg5: memref<8x32xf32, #tpu.memory_space<vmem>>, %arg6: memref<32x32xf32, #tpu.memory_space<vmem>>, %arg7: memref<32x32xf32, #tpu.memory_space<vmem>>, %arg8: memref<32x64xf32, #tpu.memory_space<vmem>>, %arg9: memref<32x64xf32, #tpu.memory_space<vmem>>, %arg10: memref<64x64xf32, #tpu.memory_space<vmem>>, %arg11: memref<2x64xf32, #tpu.memory_space<vmem>>, %arg12: memref<1x2xf32, #tpu.memory_space<vmem>>, %arg13: memref<8x64xf32, #tpu.memory_space<vmem>>, %arg14: memref<8x2xf32, #tpu.memory_space<vmem>>, %arg15: memref<2x8x32xf32, #tpu.memory_space<vmem>>, %arg16: memref<4x8x16xf32, #tpu.memory_space<vmem>>, %arg17: memref<4x8x1xf32, #tpu.memory_space<vmem>>, %arg18: memref<4x8x1xf32, #tpu.memory_space<vmem>>) attributes {dimension_semantics = [#tpu.dimension_semantics<parallel>, #tpu.dimension_semantics<arbitrary>], iteration_bounds = array<i64: 1, 1>, scalar_prefetch = 0 : i64, scratch_operands = 4 : i64, tpu.core_type = #tpu.core_type<tc>, window_params = [{transform_indices = @transform_0, window_bounds = array<i64: 8, 32>}, {transform_indices = @transform_1, window_bounds = array<i64: 8, 32>}, {pipeline_mode = #tpu.pipeline_mode<synchronous>, transform_indices = @transform_2, window_bounds = array<i64: 8, 32>}, {pipeline_mode = #tpu.pipeline_mode<synchronous>, transform_indices = @transform_3, window_bounds = array<i64: 8, 32>}, {pipeline_mode = #tpu.pipeline_mode<synchronous>, transform_indices = @transform_4, window_bounds = array<i64: 32, 32>}, {pipeline_mode = #tpu.pipeline_mode<synchronous>, transform_indices = @transform_5, window_bounds = array<i64: 32, 32>}, {pipeline_mode = #tpu.pipeline_mode<synchronous>, transform_indices = @transform_6, window_bounds = array<i64: 32, 64>}, {pipeline_mode = #tpu.pipeline_mode<synchronous>, transform_indices = @transform_7, window_bounds = array<i64: 32, 64>}, {pipeline_mode = #tpu.pipeline_mode<synchronous>, transform_indices = @transform_8, window_bounds = array<i64: 64, 64>}, {pipeline_mode = #tpu.pipeline_mode<synchronous>, transform_indices = @transform_9, window_bounds = array<i64: 2, 64>}, {pipeline_mode = #tpu.pipeline_mode<synchronous>, transform_indices = @transform_10, window_bounds = array<i64: 1, 2>}, {transform_indices = @transform_11, window_bounds = array<i64: 8, 64>}, {transform_indices = @transform_12, window_bounds = array<i64: 8, 2>}]} {
    %c0_i32 = arith.constant 0 : i32
    %0 = arith.cmpi eq, %arg1, %c0_i32 : i32
    %1 = arith.extui %0 : i1 to i32
    %c0_i32_0 = arith.constant 0 : i32
    %2 = arith.cmpi ne, %1, %c0_i32_0 : i32
    scf.if %2 {
      %c0_100 = arith.constant 0 : index
      %c0_101 = arith.constant 0 : index
      %160 = vector.load %arg2[%c0_100, %c0_101] : memref<8x32xf32, #tpu.memory_space<vmem>>, vector<8x32xf32>
      %c0_102 = arith.constant 0 : index
      %c0_103 = arith.constant 0 : index
      %161 = vector.load %arg6[%c0_102, %c0_103] : memref<32x32xf32, #tpu.memory_space<vmem>>, vector<32x32xf32>
      %cst_104 = arith.constant dense<0.000000e+00> : vector<8x32xf32>
      %162 = tpu.matmul %160, %161, %cst_104 {dimension_numbers = #tpu.dot_dimension_numbers<[1], [0], [0], [1], [0, 0, 1, 1], [], []>} : vector<8x32xf32>, vector<32x32xf32>, vector<8x32xf32> -> vector<8x32xf32>
      %c0_105 = arith.constant 0 : index
      %c0_106 = arith.constant 0 : index
      %c0_107 = arith.constant 0 : index
      %163 = vector.load %arg15[%c0_105, %c0_106, %c0_107] : memref<2x8x32xf32, #tpu.memory_space<vmem>>, vector<1x8x32xf32>
      %164 = vector.shape_cast %163 : vector<1x8x32xf32> to vector<8x32xf32>
      %165 = vector.shape_cast %162 : vector<8x32xf32> to vector<1x8x32xf32>
      tpu.vector_store %arg15[%c0_105, %c0_106, %c0_107], %165 {strides = array<i32>} : memref<2x8x32xf32, #tpu.memory_space<vmem>>, vector<1x8x32xf32>,
      %c0_108 = arith.constant 0 : index
      %c0_109 = arith.constant 0 : index
      %166 = vector.load %arg3[%c0_108, %c0_109] : memref<8x32xf32, #tpu.memory_space<vmem>>, vector<8x32xf32>
      %c0_110 = arith.constant 0 : index
      %c0_111 = arith.constant 0 : index
      %167 = vector.load %arg7[%c0_110, %c0_111] : memref<32x32xf32, #tpu.memory_space<vmem>>, vector<32x32xf32>
      %cst_112 = arith.constant dense<0.000000e+00> : vector<8x32xf32>
      %168 = tpu.matmul %166, %167, %cst_112 {dimension_numbers = #tpu.dot_dimension_numbers<[1], [0], [0], [1], [0, 0, 1, 1], [], []>} : vector<8x32xf32>, vector<32x32xf32>, vector<8x32xf32> -> vector<8x32xf32>
      %c1_113 = arith.constant 1 : index
      %c0_114 = arith.constant 0 : index
      %c0_115 = arith.constant 0 : index
      %169 = vector.load %arg15[%c1_113, %c0_114, %c0_115] : memref<2x8x32xf32, #tpu.memory_space<vmem>>, vector<1x8x32xf32>
      %170 = vector.shape_cast %169 : vector<1x8x32xf32> to vector<8x32xf32>
      %171 = vector.shape_cast %168 : vector<8x32xf32> to vector<1x8x32xf32>
      tpu.vector_store %arg15[%c1_113, %c0_114, %c0_115], %171 {strides = array<i32>} : memref<2x8x32xf32, #tpu.memory_space<vmem>>, vector<1x8x32xf32>,
      %cst_116 = arith.constant 0.000000e+00 : f32
      %172 = vector.broadcast %cst_116 : f32 to vector<4x8x16xf32>
      %c0_117 = arith.constant 0 : index
      %c0_118 = arith.constant 0 : index
      %c0_119 = arith.constant 0 : index
      %173 = vector.load %arg16[%c0_117, %c0_118, %c0_119] : memref<4x8x16xf32, #tpu.memory_space<vmem>>, vector<4x8x16xf32>
      tpu.vector_store %arg16[%c0_117, %c0_118, %c0_119], %172 {strides = array<i32>} : memref<4x8x16xf32, #tpu.memory_space<vmem>>, vector<4x8x16xf32>,
      %cst_120 = arith.constant 0xFF800000 : f32
      %174 = vector.broadcast %cst_120 : f32 to vector<4x8x1xf32>
      %c0_121 = arith.constant 0 : index
      %c0_122 = arith.constant 0 : index
      %c0_123 = arith.constant 0 : index
      %175 = vector.load %arg17[%c0_121, %c0_122, %c0_123] : memref<4x8x1xf32, #tpu.memory_space<vmem>>, vector<4x8x1xf32>
      tpu.vector_store %arg17[%c0_121, %c0_122, %c0_123], %174 {strides = array<i32>} : memref<4x8x1xf32, #tpu.memory_space<vmem>>, vector<4x8x1xf32>,
      %cst_124 = arith.constant 0.000000e+00 : f32
      %176 = vector.broadcast %cst_124 : f32 to vector<4x8x1xf32>
      %c0_125 = arith.constant 0 : index
      %c0_126 = arith.constant 0 : index
      %c0_127 = arith.constant 0 : index
      %177 = vector.load %arg18[%c0_125, %c0_126, %c0_127] : memref<4x8x1xf32, #tpu.memory_space<vmem>>, vector<4x8x1xf32>
      tpu.vector_store %arg18[%c0_125, %c0_126, %c0_127], %176 {strides = array<i32>} : memref<4x8x1xf32, #tpu.memory_space<vmem>>, vector<4x8x1xf32>,
    } else {
    }
    %c8_i32 = arith.constant 8 : i32
    %3 = arith.muli %arg1, %c8_i32 : i32
    %4 = tpu.assume_multiple %3, 8 : i32
    %5 = arith.index_cast %4 : i32 to index
    %c0 = arith.constant 0 : index
    %6 = vector.load %arg4[%5, %c0] : memref<8x32xf32, #tpu.memory_space<vmem>>, vector<8x32xf32>
    %7 = arith.index_cast %4 : i32 to index
    %c0_1 = arith.constant 0 : index
    %8 = vector.load %arg5[%7, %c0_1] : memref<8x32xf32, #tpu.memory_space<vmem>>, vector<8x32xf32>
    %c0_2 = arith.constant 0 : index
    %c0_3 = arith.constant 0 : index
    %9 = vector.load %arg8[%c0_2, %c0_3] : memref<32x64xf32, #tpu.memory_space<vmem>>, vector<32x64xf32>
    %cst = arith.constant dense<0.000000e+00> : vector<8x64xf32>
    %10 = tpu.matmul %8, %9, %cst {dimension_numbers = #tpu.dot_dimension_numbers<[1], [0], [0], [1], [0, 0, 1, 1], [], []>} : vector<8x32xf32>, vector<32x64xf32>, vector<8x64xf32> -> vector<8x64xf32>
    %c0_4 = arith.constant 0 : index
    %c0_5 = arith.constant 0 : index
    %11 = vector.load %arg9[%c0_4, %c0_5] : memref<32x64xf32, #tpu.memory_space<vmem>>, vector<32x64xf32>
    %cst_6 = arith.constant dense<0.000000e+00> : vector<8x64xf32>
    %12 = tpu.matmul %6, %11, %cst_6 {dimension_numbers = #tpu.dot_dimension_numbers<[1], [0], [0], [1], [0, 0, 1, 1], [], []>} : vector<8x32xf32>, vector<32x64xf32>, vector<8x64xf32> -> vector<8x64xf32>
    %c0_7 = arith.constant 0 : index
    %c0_8 = arith.constant 0 : index
    %c0_9 = arith.constant 0 : index
    %13 = vector.load %arg15[%c0_7, %c0_8, %c0_9] : memref<2x8x32xf32, #tpu.memory_space<vmem>>, vector<1x8x32xf32>
    %14 = vector.shape_cast %13 : vector<1x8x32xf32> to vector<8x32xf32>
    %c1 = arith.constant 1 : index
    %c0_10 = arith.constant 0 : index
    %c0_11 = arith.constant 0 : index
    %15 = vector.load %arg15[%c1, %c0_10, %c0_11] : memref<2x8x32xf32, #tpu.memory_space<vmem>>, vector<1x8x32xf32>
    %16 = vector.shape_cast %15 : vector<1x8x32xf32> to vector<8x32xf32>
    %17 = vector.extract_strided_slice %14 {offsets = [0, 0], sizes = [8, 16], strides = [1, 1]} : vector<8x32xf32> to vector<8x16xf32>
    %18 = vector.extract_strided_slice %10 {offsets = [0, 0], sizes = [8, 16], strides = [1, 1]} : vector<8x64xf32> to vector<8x16xf32>
    %19 = vector.extract_strided_slice %10 {offsets = [0, 32], sizes = [8, 16], strides = [1, 1]} : vector<8x64xf32> to vector<8x16xf32>
    %cst_12 = arith.constant dense<0.000000e+00> : vector<8x8xf32>
    %20 = tpu.matmul %17, %18, %cst_12 {dimension_numbers = #tpu.dot_dimension_numbers<[1], [1], [0], [0], [0, 0, 1, 0], [], []>} : vector<8x16xf32>, vector<8x16xf32>, vector<8x8xf32> -> vector<8x8xf32>
    %c0_13 = arith.constant 0 : index
    %c0_14 = arith.constant 0 : index
    %c0_15 = arith.constant 0 : index
    %21 = vector.load %arg17[%c0_13, %c0_14, %c0_15] : memref<4x8x1xf32, #tpu.memory_space<vmem>>, vector<1x8x1xf32>
    %22 = vector.shape_cast %21 : vector<1x8x1xf32> to vector<8x1xf32>
    %cst_16 = arith.constant dense<0xFF800000> : vector<8xf32>
    %23 = vector.multi_reduction <maximumf>, %20, %cst_16 [1] : vector<8x8xf32> to vector<8xf32>
    %24 = vector.shape_cast %23 : vector<8xf32> to vector<8x1xf32>
    %25 = arith.maximumf %22, %24 : vector<8x1xf32>
    %26 = arith.subf %22, %25 : vector<8x1xf32>
    %27 = math.exp %26 : vector<8x1xf32>
    %28 = vector.broadcast %25 : vector<8x1xf32> to vector<8x8xf32>
    %29 = arith.subf %20, %28 : vector<8x8xf32>
    %30 = math.exp %29 : vector<8x8xf32>
    %c0_17 = arith.constant 0 : index
    %c0_18 = arith.constant 0 : index
    %c0_19 = arith.constant 0 : index
    %31 = vector.load %arg18[%c0_17, %c0_18, %c0_19] : memref<4x8x1xf32, #tpu.memory_space<vmem>>, vector<1x8x1xf32>
    %32 = vector.shape_cast %31 : vector<1x8x1xf32> to vector<8x1xf32>
    %33 = arith.mulf %27, %32 : vector<8x1xf32>
    %cst_20 = arith.constant dense<0.000000e+00> : vector<8xf32>
    %34 = vector.multi_reduction <add>, %30, %cst_20 [1] : vector<8x8xf32> to vector<8xf32>
    %35 = vector.shape_cast %34 : vector<8xf32> to vector<8x1xf32>
    %36 = arith.addf %33, %35 : vector<8x1xf32>
    %c0_21 = arith.constant 0 : index
    %c0_22 = arith.constant 0 : index
    %c0_23 = arith.constant 0 : index
    %37 = vector.load %arg18[%c0_21, %c0_22, %c0_23] : memref<4x8x1xf32, #tpu.memory_space<vmem>>, vector<1x8x1xf32>
    %38 = vector.shape_cast %37 : vector<1x8x1xf32> to vector<8x1xf32>
    %39 = vector.shape_cast %36 : vector<8x1xf32> to vector<1x8x1xf32>
    tpu.vector_store %arg18[%c0_21, %c0_22, %c0_23], %39 {strides = array<i32>} : memref<4x8x1xf32, #tpu.memory_space<vmem>>, vector<1x8x1xf32>,
    %c0_24 = arith.constant 0 : index
    %c0_25 = arith.constant 0 : index
    %c0_26 = arith.constant 0 : index
    %40 = vector.load %arg16[%c0_24, %c0_25, %c0_26] : memref<4x8x16xf32, #tpu.memory_space<vmem>>, vector<1x8x16xf32>
    %41 = vector.shape_cast %40 : vector<1x8x16xf32> to vector<8x16xf32>
    %42 = vector.broadcast %27 : vector<8x1xf32> to vector<8x16xf32>
    %43 = arith.mulf %42, %41 : vector<8x16xf32>
    %cst_27 = arith.constant dense<0.000000e+00> : vector<8x16xf32>
    %44 = tpu.matmul %30, %19, %cst_27 {dimension_numbers = #tpu.dot_dimension_numbers<[1], [0], [0], [1], [0, 0, 1, 1], [], []>} : vector<8x8xf32>, vector<8x16xf32>, vector<8x16xf32> -> vector<8x16xf32>
    %45 = arith.addf %43, %44 : vector<8x16xf32>
    %c0_28 = arith.constant 0 : index
    %c0_29 = arith.constant 0 : index
    %c0_30 = arith.constant 0 : index
    %46 = vector.load %arg16[%c0_28, %c0_29, %c0_30] : memref<4x8x16xf32, #tpu.memory_space<vmem>>, vector<1x8x16xf32>
    %47 = vector.shape_cast %46 : vector<1x8x16xf32> to vector<8x16xf32>
    %48 = vector.shape_cast %45 : vector<8x16xf32> to vector<1x8x16xf32>
    tpu.vector_store %arg16[%c0_28, %c0_29, %c0_30], %48 {strides = array<i32>} : memref<4x8x16xf32, #tpu.memory_space<vmem>>, vector<1x8x16xf32>,
    %c0_31 = arith.constant 0 : index
    %c0_32 = arith.constant 0 : index
    %c0_33 = arith.constant 0 : index
    %49 = vector.load %arg17[%c0_31, %c0_32, %c0_33] : memref<4x8x1xf32, #tpu.memory_space<vmem>>, vector<1x8x1xf32>
    %50 = vector.shape_cast %49 : vector<1x8x1xf32> to vector<8x1xf32>
    %51 = vector.shape_cast %25 : vector<8x1xf32> to vector<1x8x1xf32>
    tpu.vector_store %arg17[%c0_31, %c0_32, %c0_33], %51 {strides = array<i32>} : memref<4x8x1xf32, #tpu.memory_space<vmem>>, vector<1x8x1xf32>,
    %52 = vector.extract_strided_slice %14 {offsets = [0, 16], sizes = [8, 16], strides = [1, 1]} : vector<8x32xf32> to vector<8x16xf32>
    %53 = vector.extract_strided_slice %10 {offsets = [0, 16], sizes = [8, 16], strides = [1, 1]} : vector<8x64xf32> to vector<8x16xf32>
    %54 = vector.extract_strided_slice %10 {offsets = [0, 48], sizes = [8, 16], strides = [1, 1]} : vector<8x64xf32> to vector<8x16xf32>
    %cst_34 = arith.constant dense<0.000000e+00> : vector<8x8xf32>
    %55 = tpu.matmul %52, %53, %cst_34 {dimension_numbers = #tpu.dot_dimension_numbers<[1], [1], [0], [0], [0, 0, 1, 0], [], []>} : vector<8x16xf32>, vector<8x16xf32>, vector<8x8xf32> -> vector<8x8xf32>
    %c1_35 = arith.constant 1 : index
    %c0_36 = arith.constant 0 : index
    %c0_37 = arith.constant 0 : index
    %56 = vector.load %arg17[%c1_35, %c0_36, %c0_37] : memref<4x8x1xf32, #tpu.memory_space<vmem>>, vector<1x8x1xf32>
    %57 = vector.shape_cast %56 : vector<1x8x1xf32> to vector<8x1xf32>
    %cst_38 = arith.constant dense<0xFF800000> : vector<8xf32>
    %58 = vector.multi_reduction <maximumf>, %55, %cst_38 [1] : vector<8x8xf32> to vector<8xf32>
    %59 = vector.shape_cast %58 : vector<8xf32> to vector<8x1xf32>
    %60 = arith.maximumf %57, %59 : vector<8x1xf32>
    %61 = arith.subf %57, %60 : vector<8x1xf32>
    %62 = math.exp %61 : vector<8x1xf32>
    %63 = vector.broadcast %60 : vector<8x1xf32> to vector<8x8xf32>
    %64 = arith.subf %55, %63 : vector<8x8xf32>
    %65 = math.exp %64 : vector<8x8xf32>
    %c1_39 = arith.constant 1 : index
    %c0_40 = arith.constant 0 : index
    %c0_41 = arith.constant 0 : index
    %66 = vector.load %arg18[%c1_39, %c0_40, %c0_41] : memref<4x8x1xf32, #tpu.memory_space<vmem>>, vector<1x8x1xf32>
    %67 = vector.shape_cast %66 : vector<1x8x1xf32> to vector<8x1xf32>
    %68 = arith.mulf %62, %67 : vector<8x1xf32>
    %cst_42 = arith.constant dense<0.000000e+00> : vector<8xf32>
    %69 = vector.multi_reduction <add>, %65, %cst_42 [1] : vector<8x8xf32> to vector<8xf32>
    %70 = vector.shape_cast %69 : vector<8xf32> to vector<8x1xf32>
    %71 = arith.addf %68, %70 : vector<8x1xf32>
    %c1_43 = arith.constant 1 : index
    %c0_44 = arith.constant 0 : index
    %c0_45 = arith.constant 0 : index
    %72 = vector.load %arg18[%c1_43, %c0_44, %c0_45] : memref<4x8x1xf32, #tpu.memory_space<vmem>>, vector<1x8x1xf32>
    %73 = vector.shape_cast %72 : vector<1x8x1xf32> to vector<8x1xf32>
    %74 = vector.shape_cast %71 : vector<8x1xf32> to vector<1x8x1xf32>
    tpu.vector_store %arg18[%c1_43, %c0_44, %c0_45], %74 {strides = array<i32>} : memref<4x8x1xf32, #tpu.memory_space<vmem>>, vector<1x8x1xf32>,
    %c1_46 = arith.constant 1 : index
    %c0_47 = arith.constant 0 : index
    %c0_48 = arith.constant 0 : index
    %75 = vector.load %arg16[%c1_46, %c0_47, %c0_48] : memref<4x8x16xf32, #tpu.memory_space<vmem>>, vector<1x8x16xf32>
    %76 = vector.shape_cast %75 : vector<1x8x16xf32> to vector<8x16xf32>
    %77 = vector.broadcast %62 : vector<8x1xf32> to vector<8x16xf32>
    %78 = arith.mulf %77, %76 : vector<8x16xf32>
    %cst_49 = arith.constant dense<0.000000e+00> : vector<8x16xf32>
    %79 = tpu.matmul %65, %54, %cst_49 {dimension_numbers = #tpu.dot_dimension_numbers<[1], [0], [0], [1], [0, 0, 1, 1], [], []>} : vector<8x8xf32>, vector<8x16xf32>, vector<8x16xf32> -> vector<8x16xf32>
    %80 = arith.addf %78, %79 : vector<8x16xf32>
    %c1_50 = arith.constant 1 : index
    %c0_51 = arith.constant 0 : index
    %c0_52 = arith.constant 0 : index
    %81 = vector.load %arg16[%c1_50, %c0_51, %c0_52] : memref<4x8x16xf32, #tpu.memory_space<vmem>>, vector<1x8x16xf32>
    %82 = vector.shape_cast %81 : vector<1x8x16xf32> to vector<8x16xf32>
    %83 = vector.shape_cast %80 : vector<8x16xf32> to vector<1x8x16xf32>
    tpu.vector_store %arg16[%c1_50, %c0_51, %c0_52], %83 {strides = array<i32>} : memref<4x8x16xf32, #tpu.memory_space<vmem>>, vector<1x8x16xf32>,
    %c1_53 = arith.constant 1 : index
    %c0_54 = arith.constant 0 : index
    %c0_55 = arith.constant 0 : index
    %84 = vector.load %arg17[%c1_53, %c0_54, %c0_55] : memref<4x8x1xf32, #tpu.memory_space<vmem>>, vector<1x8x1xf32>
    %85 = vector.shape_cast %84 : vector<1x8x1xf32> to vector<8x1xf32>
    %86 = vector.shape_cast %60 : vector<8x1xf32> to vector<1x8x1xf32>
    tpu.vector_store %arg17[%c1_53, %c0_54, %c0_55], %86 {strides = array<i32>} : memref<4x8x1xf32, #tpu.memory_space<vmem>>, vector<1x8x1xf32>,
    %87 = vector.extract_strided_slice %16 {offsets = [0, 0], sizes = [8, 16], strides = [1, 1]} : vector<8x32xf32> to vector<8x16xf32>
    %88 = vector.extract_strided_slice %12 {offsets = [0, 0], sizes = [8, 16], strides = [1, 1]} : vector<8x64xf32> to vector<8x16xf32>
    %89 = vector.extract_strided_slice %12 {offsets = [0, 32], sizes = [8, 16], strides = [1, 1]} : vector<8x64xf32> to vector<8x16xf32>
    %cst_56 = arith.constant dense<0.000000e+00> : vector<8x8xf32>
    %90 = tpu.matmul %87, %88, %cst_56 {dimension_numbers = #tpu.dot_dimension_numbers<[1], [1], [0], [0], [0, 0, 1, 0], [], []>} : vector<8x16xf32>, vector<8x16xf32>, vector<8x8xf32> -> vector<8x8xf32>
    %c2 = arith.constant 2 : index
    %c0_57 = arith.constant 0 : index
    %c0_58 = arith.constant 0 : index
    %91 = vector.load %arg17[%c2, %c0_57, %c0_58] : memref<4x8x1xf32, #tpu.memory_space<vmem>>, vector<1x8x1xf32>
    %92 = vector.shape_cast %91 : vector<1x8x1xf32> to vector<8x1xf32>
    %cst_59 = arith.constant dense<0xFF800000> : vector<8xf32>
    %93 = vector.multi_reduction <maximumf>, %90, %cst_59 [1] : vector<8x8xf32> to vector<8xf32>
    %94 = vector.shape_cast %93 : vector<8xf32> to vector<8x1xf32>
    %95 = arith.maximumf %92, %94 : vector<8x1xf32>
    %96 = arith.subf %92, %95 : vector<8x1xf32>
    %97 = math.exp %96 : vector<8x1xf32>
    %98 = vector.broadcast %95 : vector<8x1xf32> to vector<8x8xf32>
    %99 = arith.subf %90, %98 : vector<8x8xf32>
    %100 = math.exp %99 : vector<8x8xf32>
    %c2_60 = arith.constant 2 : index
    %c0_61 = arith.constant 0 : index
    %c0_62 = arith.constant 0 : index
    %101 = vector.load %arg18[%c2_60, %c0_61, %c0_62] : memref<4x8x1xf32, #tpu.memory_space<vmem>>, vector<1x8x1xf32>
    %102 = vector.shape_cast %101 : vector<1x8x1xf32> to vector<8x1xf32>
    %103 = arith.mulf %97, %102 : vector<8x1xf32>
    %cst_63 = arith.constant dense<0.000000e+00> : vector<8xf32>
    %104 = vector.multi_reduction <add>, %100, %cst_63 [1] : vector<8x8xf32> to vector<8xf32>
    %105 = vector.shape_cast %104 : vector<8xf32> to vector<8x1xf32>
    %106 = arith.addf %103, %105 : vector<8x1xf32>
    %c2_64 = arith.constant 2 : index
    %c0_65 = arith.constant 0 : index
    %c0_66 = arith.constant 0 : index
    %107 = vector.load %arg18[%c2_64, %c0_65, %c0_66] : memref<4x8x1xf32, #tpu.memory_space<vmem>>, vector<1x8x1xf32>
    %108 = vector.shape_cast %107 : vector<1x8x1xf32> to vector<8x1xf32>
    %109 = vector.shape_cast %106 : vector<8x1xf32> to vector<1x8x1xf32>
    tpu.vector_store %arg18[%c2_64, %c0_65, %c0_66], %109 {strides = array<i32>} : memref<4x8x1xf32, #tpu.memory_space<vmem>>, vector<1x8x1xf32>,
    %c2_67 = arith.constant 2 : index
    %c0_68 = arith.constant 0 : index
    %c0_69 = arith.constant 0 : index
    %110 = vector.load %arg16[%c2_67, %c0_68, %c0_69] : memref<4x8x16xf32, #tpu.memory_space<vmem>>, vector<1x8x16xf32>
    %111 = vector.shape_cast %110 : vector<1x8x16xf32> to vector<8x16xf32>
    %112 = vector.broadcast %97 : vector<8x1xf32> to vector<8x16xf32>
    %113 = arith.mulf %112, %111 : vector<8x16xf32>
    %cst_70 = arith.constant dense<0.000000e+00> : vector<8x16xf32>
    %114 = tpu.matmul %100, %89, %cst_70 {dimension_numbers = #tpu.dot_dimension_numbers<[1], [0], [0], [1], [0, 0, 1, 1], [], []>} : vector<8x8xf32>, vector<8x16xf32>, vector<8x16xf32> -> vector<8x16xf32>
    %115 = arith.addf %113, %114 : vector<8x16xf32>
    %c2_71 = arith.constant 2 : index
    %c0_72 = arith.constant 0 : index
    %c0_73 = arith.constant 0 : index
    %116 = vector.load %arg16[%c2_71, %c0_72, %c0_73] : memref<4x8x16xf32, #tpu.memory_space<vmem>>, vector<1x8x16xf32>
    %117 = vector.shape_cast %116 : vector<1x8x16xf32> to vector<8x16xf32>
    %118 = vector.shape_cast %115 : vector<8x16xf32> to vector<1x8x16xf32>
    tpu.vector_store %arg16[%c2_71, %c0_72, %c0_73], %118 {strides = array<i32>} : memref<4x8x16xf32, #tpu.memory_space<vmem>>, vector<1x8x16xf32>,
    %c2_74 = arith.constant 2 : index
    %c0_75 = arith.constant 0 : index
    %c0_76 = arith.constant 0 : index
    %119 = vector.load %arg17[%c2_74, %c0_75, %c0_76] : memref<4x8x1xf32, #tpu.memory_space<vmem>>, vector<1x8x1xf32>
    %120 = vector.shape_cast %119 : vector<1x8x1xf32> to vector<8x1xf32>
    %121 = vector.shape_cast %95 : vector<8x1xf32> to vector<1x8x1xf32>
    tpu.vector_store %arg17[%c2_74, %c0_75, %c0_76], %121 {strides = array<i32>} : memref<4x8x1xf32, #tpu.memory_space<vmem>>, vector<1x8x1xf32>,
    %122 = vector.extract_strided_slice %16 {offsets = [0, 16], sizes = [8, 16], strides = [1, 1]} : vector<8x32xf32> to vector<8x16xf32>
    %123 = vector.extract_strided_slice %12 {offsets = [0, 16], sizes = [8, 16], strides = [1, 1]} : vector<8x64xf32> to vector<8x16xf32>
    %124 = vector.extract_strided_slice %12 {offsets = [0, 48], sizes = [8, 16], strides = [1, 1]} : vector<8x64xf32> to vector<8x16xf32>
    %cst_77 = arith.constant dense<0.000000e+00> : vector<8x8xf32>
    %125 = tpu.matmul %122, %123, %cst_77 {dimension_numbers = #tpu.dot_dimension_numbers<[1], [1], [0], [0], [0, 0, 1, 0], [], []>} : vector<8x16xf32>, vector<8x16xf32>, vector<8x8xf32> -> vector<8x8xf32>
    %c3 = arith.constant 3 : index
    %c0_78 = arith.constant 0 : index
    %c0_79 = arith.constant 0 : index
    %126 = vector.load %arg17[%c3, %c0_78, %c0_79] : memref<4x8x1xf32, #tpu.memory_space<vmem>>, vector<1x8x1xf32>
    %127 = vector.shape_cast %126 : vector<1x8x1xf32> to vector<8x1xf32>
    %cst_80 = arith.constant dense<0xFF800000> : vector<8xf32>
    %128 = vector.multi_reduction <maximumf>, %125, %cst_80 [1] : vector<8x8xf32> to vector<8xf32>
    %129 = vector.shape_cast %128 : vector<8xf32> to vector<8x1xf32>
    %130 = arith.maximumf %127, %129 : vector<8x1xf32>
    %131 = arith.subf %127, %130 : vector<8x1xf32>
    %132 = math.exp %131 : vector<8x1xf32>
    %133 = vector.broadcast %130 : vector<8x1xf32> to vector<8x8xf32>
    %134 = arith.subf %125, %133 : vector<8x8xf32>
    %135 = math.exp %134 : vector<8x8xf32>
    %c3_81 = arith.constant 3 : index
    %c0_82 = arith.constant 0 : index
    %c0_83 = arith.constant 0 : index
    %136 = vector.load %arg18[%c3_81, %c0_82, %c0_83] : memref<4x8x1xf32, #tpu.memory_space<vmem>>, vector<1x8x1xf32>
    %137 = vector.shape_cast %136 : vector<1x8x1xf32> to vector<8x1xf32>
    %138 = arith.mulf %132, %137 : vector<8x1xf32>
    %cst_84 = arith.constant dense<0.000000e+00> : vector<8xf32>
    %139 = vector.multi_reduction <add>, %135, %cst_84 [1] : vector<8x8xf32> to vector<8xf32>
    %140 = vector.shape_cast %139 : vector<8xf32> to vector<8x1xf32>
    %141 = arith.addf %138, %140 : vector<8x1xf32>
    %c3_85 = arith.constant 3 : index
    %c0_86 = arith.constant 0 : index
    %c0_87 = arith.constant 0 : index
    %142 = vector.load %arg18[%c3_85, %c0_86, %c0_87] : memref<4x8x1xf32, #tpu.memory_space<vmem>>, vector<1x8x1xf32>
    %143 = vector.shape_cast %142 : vector<1x8x1xf32> to vector<8x1xf32>
    %144 = vector.shape_cast %141 : vector<8x1xf32> to vector<1x8x1xf32>
    tpu.vector_store %arg18[%c3_85, %c0_86, %c0_87], %144 {strides = array<i32>} : memref<4x8x1xf32, #tpu.memory_space<vmem>>, vector<1x8x1xf32>,
    %c3_88 = arith.constant 3 : index
    %c0_89 = arith.constant 0 : index
    %c0_90 = arith.constant 0 : index
    %145 = vector.load %arg16[%c3_88, %c0_89, %c0_90] : memref<4x8x16xf32, #tpu.memory_space<vmem>>, vector<1x8x16xf32>
    %146 = vector.shape_cast %145 : vector<1x8x16xf32> to vector<8x16xf32>
    %147 = vector.broadcast %132 : vector<8x1xf32> to vector<8x16xf32>
    %148 = arith.mulf %147, %146 : vector<8x16xf32>
    %cst_91 = arith.constant dense<0.000000e+00> : vector<8x16xf32>
    %149 = tpu.matmul %135, %124, %cst_91 {dimension_numbers = #tpu.dot_dimension_numbers<[1], [0], [0], [1], [0, 0, 1, 1], [], []>} : vector<8x8xf32>, vector<8x16xf32>, vector<8x16xf32> -> vector<8x16xf32>
    %150 = arith.addf %148, %149 : vector<8x16xf32>
    %c3_92 = arith.constant 3 : index
    %c0_93 = arith.constant 0 : index
    %c0_94 = arith.constant 0 : index
    %151 = vector.load %arg16[%c3_92, %c0_93, %c0_94] : memref<4x8x16xf32, #tpu.memory_space<vmem>>, vector<1x8x16xf32>
    %152 = vector.shape_cast %151 : vector<1x8x16xf32> to vector<8x16xf32>
    %153 = vector.shape_cast %150 : vector<8x16xf32> to vector<1x8x16xf32>
    tpu.vector_store %arg16[%c3_92, %c0_93, %c0_94], %153 {strides = array<i32>} : memref<4x8x16xf32, #tpu.memory_space<vmem>>, vector<1x8x16xf32>,
    %c3_95 = arith.constant 3 : index
    %c0_96 = arith.constant 0 : index
    %c0_97 = arith.constant 0 : index
    %154 = vector.load %arg17[%c3_95, %c0_96, %c0_97] : memref<4x8x1xf32, #tpu.memory_space<vmem>>, vector<1x8x1xf32>
    %155 = vector.shape_cast %154 : vector<1x8x1xf32> to vector<8x1xf32>
    %156 = vector.shape_cast %130 : vector<8x1xf32> to vector<1x8x1xf32>
    tpu.vector_store %arg17[%c3_95, %c0_96, %c0_97], %156 {strides = array<i32>} : memref<4x8x1xf32, #tpu.memory_space<vmem>>, vector<1x8x1xf32>,
    %c0_i32_98 = arith.constant 0 : i32
    %157 = arith.cmpi eq, %arg1, %c0_i32_98 : i32
    %158 = arith.extui %157 : i1 to i32
    %c0_i32_99 = arith.constant 0 : i32
    %159 = arith.cmpi ne, %158, %c0_i32_99 : i32
    scf.if %159 {
      %c0_100 = arith.constant 0 : index
      %c0_101 = arith.constant 0 : index
      %c0_102 = arith.constant 0 : index
      %160 = vector.load %arg16[%c0_100, %c0_101, %c0_102] : memref<4x8x16xf32, #tpu.memory_space<vmem>>, vector<1x8x16xf32>
      %161 = vector.shape_cast %160 : vector<1x8x16xf32> to vector<8x16xf32>
      %c0_103 = arith.constant 0 : index
      %c0_104 = arith.constant 0 : index
      %c0_105 = arith.constant 0 : index
      %162 = vector.load %arg18[%c0_103, %c0_104, %c0_105] : memref<4x8x1xf32, #tpu.memory_space<vmem>>, vector<1x8x1xf32>
      %163 = vector.shape_cast %162 : vector<1x8x1xf32> to vector<8x1xf32>
      %cst_106 = arith.constant 1.000000e+00 : f32
      %164 = vector.broadcast %cst_106 : f32 to vector<8x1xf32>
      %165 = arith.divf %164, %163 : vector<8x1xf32>
      %166 = vector.broadcast %165 : vector<8x1xf32> to vector<8x16xf32>
      %167 = arith.mulf %161, %166 : vector<8x16xf32>
      %c0_107 = arith.constant 0 : index
      %c0_108 = arith.constant 0 : index
      %168 = vector.load %arg10[%c0_107, %c0_108] : memref<64x64xf32, #tpu.memory_space<vmem>>, vector<16x64xf32>
      %cst_109 = arith.constant dense<0.000000e+00> : vector<8x64xf32>
      %169 = tpu.matmul %167, %168, %cst_109 {dimension_numbers = #tpu.dot_dimension_numbers<[1], [0], [0], [1], [0, 0, 1, 1], [], []>} : vector<8x16xf32>, vector<16x64xf32>, vector<8x64xf32> -> vector<8x64xf32>
      %c1_110 = arith.constant 1 : index
      %c0_111 = arith.constant 0 : index
      %c0_112 = arith.constant 0 : index
      %170 = vector.load %arg16[%c1_110, %c0_111, %c0_112] : memref<4x8x16xf32, #tpu.memory_space<vmem>>, vector<1x8x16xf32>
      %171 = vector.shape_cast %170 : vector<1x8x16xf32> to vector<8x16xf32>
      %c1_113 = arith.constant 1 : index
      %c0_114 = arith.constant 0 : index
      %c0_115 = arith.constant 0 : index
      %172 = vector.load %arg18[%c1_113, %c0_114, %c0_115] : memref<4x8x1xf32, #tpu.memory_space<vmem>>, vector<1x8x1xf32>
      %173 = vector.shape_cast %172 : vector<1x8x1xf32> to vector<8x1xf32>
      %cst_116 = arith.constant 1.000000e+00 : f32
      %174 = vector.broadcast %cst_116 : f32 to vector<8x1xf32>
      %175 = arith.divf %174, %173 : vector<8x1xf32>
      %176 = vector.broadcast %175 : vector<8x1xf32> to vector<8x16xf32>
      %177 = arith.mulf %171, %176 : vector<8x16xf32>
      %c16 = arith.constant 16 : index
      %c0_117 = arith.constant 0 : index
      %178 = vector.load %arg10[%c16, %c0_117] : memref<64x64xf32, #tpu.memory_space<vmem>>, vector<16x64xf32>
      %cst_118 = arith.constant dense<0.000000e+00> : vector<8x64xf32>
      %179 = tpu.matmul %177, %178, %cst_118 {dimension_numbers = #tpu.dot_dimension_numbers<[1], [0], [0], [1], [0, 0, 1, 1], [], []>} : vector<8x16xf32>, vector<16x64xf32>, vector<8x64xf32> -> vector<8x64xf32>
      %180 = arith.addf %169, %179 : vector<8x64xf32>
      %c2_119 = arith.constant 2 : index
      %c0_120 = arith.constant 0 : index
      %c0_121 = arith.constant 0 : index
      %181 = vector.load %arg16[%c2_119, %c0_120, %c0_121] : memref<4x8x16xf32, #tpu.memory_space<vmem>>, vector<1x8x16xf32>
      %182 = vector.shape_cast %181 : vector<1x8x16xf32> to vector<8x16xf32>
      %c2_122 = arith.constant 2 : index
      %c0_123 = arith.constant 0 : index
      %c0_124 = arith.constant 0 : index
      %183 = vector.load %arg18[%c2_122, %c0_123, %c0_124] : memref<4x8x1xf32, #tpu.memory_space<vmem>>, vector<1x8x1xf32>
      %184 = vector.shape_cast %183 : vector<1x8x1xf32> to vector<8x1xf32>
      %cst_125 = arith.constant 1.000000e+00 : f32
      %185 = vector.broadcast %cst_125 : f32 to vector<8x1xf32>
      %186 = arith.divf %185, %184 : vector<8x1xf32>
      %187 = vector.broadcast %186 : vector<8x1xf32> to vector<8x16xf32>
      %188 = arith.mulf %182, %187 : vector<8x16xf32>
      %c32 = arith.constant 32 : index
      %c0_126 = arith.constant 0 : index
      %189 = vector.load %arg10[%c32, %c0_126] : memref<64x64xf32, #tpu.memory_space<vmem>>, vector<16x64xf32>
      %cst_127 = arith.constant dense<0.000000e+00> : vector<8x64xf32>
      %190 = tpu.matmul %188, %189, %cst_127 {dimension_numbers = #tpu.dot_dimension_numbers<[1], [0], [0], [1], [0, 0, 1, 1], [], []>} : vector<8x16xf32>, vector<16x64xf32>, vector<8x64xf32> -> vector<8x64xf32>
      %191 = arith.addf %180, %190 : vector<8x64xf32>
      %c3_128 = arith.constant 3 : index
      %c0_129 = arith.constant 0 : index
      %c0_130 = arith.constant 0 : index
      %192 = vector.load %arg16[%c3_128, %c0_129, %c0_130] : memref<4x8x16xf32, #tpu.memory_space<vmem>>, vector<1x8x16xf32>
      %193 = vector.shape_cast %192 : vector<1x8x16xf32> to vector<8x16xf32>
      %c3_131 = arith.constant 3 : index
      %c0_132 = arith.constant 0 : index
      %c0_133 = arith.constant 0 : index
      %194 = vector.load %arg18[%c3_131, %c0_132, %c0_133] : memref<4x8x1xf32, #tpu.memory_space<vmem>>, vector<1x8x1xf32>
      %195 = vector.shape_cast %194 : vector<1x8x1xf32> to vector<8x1xf32>
      %cst_134 = arith.constant 1.000000e+00 : f32
      %196 = vector.broadcast %cst_134 : f32 to vector<8x1xf32>
      %197 = arith.divf %196, %195 : vector<8x1xf32>
      %198 = vector.broadcast %197 : vector<8x1xf32> to vector<8x16xf32>
      %199 = arith.mulf %193, %198 : vector<8x16xf32>
      %c48 = arith.constant 48 : index
      %c0_135 = arith.constant 0 : index
      %200 = vector.load %arg10[%c48, %c0_135] : memref<64x64xf32, #tpu.memory_space<vmem>>, vector<16x64xf32>
      %cst_136 = arith.constant dense<0.000000e+00> : vector<8x64xf32>
      %201 = tpu.matmul %199, %200, %cst_136 {dimension_numbers = #tpu.dot_dimension_numbers<[1], [0], [0], [1], [0, 0, 1, 1], [], []>} : vector<8x16xf32>, vector<16x64xf32>, vector<8x64xf32> -> vector<8x64xf32>
      %202 = arith.addf %191, %201 : vector<8x64xf32>
      %c0_137 = arith.constant 0 : index
      %c0_138 = arith.constant 0 : index
      %203 = vector.load %arg13[%c0_137, %c0_138] : memref<8x64xf32, #tpu.memory_space<vmem>>, vector<8x64xf32>
      tpu.vector_store %arg13[%c0_137, %c0_138], %202 {strides = array<i32>} : memref<8x64xf32, #tpu.memory_space<vmem>>, vector<8x64xf32>,
      %c0_139 = arith.constant 0 : index
      %c0_140 = arith.constant 0 : index
      %204 = vector.load %arg11[%c0_139, %c0_140] : memref<2x64xf32, #tpu.memory_space<vmem>>, vector<2x64xf32>
      %cst_141 = arith.constant dense<0.000000e+00> : vector<8x2xf32>
      %205 = tpu.matmul %202, %204, %cst_141 {dimension_numbers = #tpu.dot_dimension_numbers<[1], [1], [0], [0], [0, 0, 1, 0], [], []>} : vector<8x64xf32>, vector<2x64xf32>, vector<8x2xf32> -> vector<8x2xf32>
      %206 = arith.mulf %202, %202 : vector<8x64xf32>
      %cst_142 = arith.constant dense<0.000000e+00> : vector<8xf32>
      %207 = vector.multi_reduction <add>, %206, %cst_142 [1] : vector<8x64xf32> to vector<8xf32>
      %208 = vector.shape_cast %207 : vector<8xf32> to vector<8x1xf32>
      %c0_143 = arith.constant 0 : index
      %c0_144 = arith.constant 0 : index
      %209 = vector.load %arg12[%c0_143, %c0_144] : memref<1x2xf32, #tpu.memory_space<vmem>>, vector<1x2xf32>
      %210 = vector.broadcast %208 : vector<8x1xf32> to vector<8x2xf32>
      %211 = vector.broadcast %209 : vector<1x2xf32> to vector<8x2xf32>
      %212 = arith.addf %210, %211 : vector<8x2xf32>
      %cst_145 = arith.constant 2.000000e+00 : f32
      %213 = vector.broadcast %cst_145 : f32 to vector<8x2xf32>
      %214 = arith.mulf %213, %205 : vector<8x2xf32>
      %215 = arith.subf %212, %214 : vector<8x2xf32>
      %cst_146 = arith.constant 0.000000e+00 : f32
      %216 = vector.broadcast %cst_146 : f32 to vector<8x2xf32>
      %217 = arith.maximumf %215, %216 : vector<8x2xf32>
      %cst_147 = arith.constant 1.000000e+00 : f32
      %218 = vector.broadcast %cst_147 : f32 to vector<8x2xf32>
      %219 = arith.divf %217, %218 : vector<8x2xf32>
      %cst_148 = arith.constant 1.000000e+00 : f32
      %220 = vector.broadcast %cst_148 : f32 to vector<8x2xf32>
      %221 = arith.addf %220, %219 : vector<8x2xf32>
      %cst_149 = arith.constant 9.99999993E-9 : f32
      %222 = vector.broadcast %cst_149 : f32 to vector<8x2xf32>
      %223 = arith.addf %221, %222 : vector<8x2xf32>
      %cst_150 = arith.constant 1.000000e+00 : f32
      %224 = vector.broadcast %cst_150 : f32 to vector<8x2xf32>
      %225 = arith.divf %224, %223 : vector<8x2xf32>
      %226 = arith.mulf %225, %225 : vector<8x2xf32>
      %cst_151 = arith.constant 5.000000e-01 : f32
      %227 = vector.broadcast %cst_151 : f32 to vector<8x2xf32>
      %228 = arith.mulf %226, %227 : vector<8x2xf32>
      %cst_152 = arith.constant dense<0.000000e+00> : vector<8xf32>
      %229 = vector.multi_reduction <add>, %228, %cst_152 [1] : vector<8x2xf32> to vector<8xf32>
      %230 = vector.shape_cast %229 : vector<8xf32> to vector<8x1xf32>
      %231 = vector.broadcast %230 : vector<8x1xf32> to vector<8x2xf32>
      %232 = arith.divf %228, %231 : vector<8x2xf32>
      %c0_153 = arith.constant 0 : index
      %c0_154 = arith.constant 0 : index
      %233 = vector.load %arg14[%c0_153, %c0_154] : memref<8x2xf32, #tpu.memory_space<vmem>>, vector<8x2xf32>
      tpu.vector_store %arg14[%c0_153, %c0_154], %232 {strides = array<i32>} : memref<8x2xf32, #tpu.memory_space<vmem>>, vector<8x2xf32>,
    } else {
    }
    return
  }
  func.func @transform_0(%arg0: i32, %arg1: i32) -> (i32, i32) {
    %c0_i32 = arith.constant 0 : i32
    %c0_i32_0 = arith.constant 0 : i32
    return %arg0, %c0_i32 : i32, i32
  }
  func.func @transform_1(%arg0: i32, %arg1: i32) -> (i32, i32) {
    %c0_i32 = arith.constant 0 : i32
    %c0_i32_0 = arith.constant 0 : i32
    return %arg0, %c0_i32 : i32, i32
  }
  func.func @transform_2(%arg0: i32, %arg1: i32) -> (i32, i32) {
    %c0_i32 = arith.constant 0 : i32
    %c0_i32_0 = arith.constant 0 : i32
    %c0_i32_1 = arith.constant 0 : i32
    return %c0_i32, %c0_i32_0 : i32, i32
  }
  func.func @transform_3(%arg0: i32, %arg1: i32) -> (i32, i32) {
    %c0_i32 = arith.constant 0 : i32
    %c0_i32_0 = arith.constant 0 : i32
    %c0_i32_1 = arith.constant 0 : i32
    return %c0_i32, %c0_i32_0 : i32, i32
  }
  func.func @transform_4(%arg0: i32, %arg1: i32) -> (i32, i32) {
    %c0_i32 = arith.constant 0 : i32
    %c0_i32_0 = arith.constant 0 : i32
    %c0_i32_1 = arith.constant 0 : i32
    return %c0_i32, %c0_i32_0 : i32, i32
  }
  func.func @transform_5(%arg0: i32, %arg1: i32) -> (i32, i32) {
    %c0_i32 = arith.constant 0 : i32
    %c0_i32_0 = arith.constant 0 : i32
    %c0_i32_1 = arith.constant 0 : i32
    return %c0_i32, %c0_i32_0 : i32, i32
  }
  func.func @transform_6(%arg0: i32, %arg1: i32) -> (i32, i32) {
    %c0_i32 = arith.constant 0 : i32
    %c0_i32_0 = arith.constant 0 : i32
    %c0_i32_1 = arith.constant 0 : i32
    return %c0_i32, %c0_i32_0 : i32, i32
  }
  func.func @transform_7(%arg0: i32, %arg1: i32) -> (i32, i32) {
    %c0_i32 = arith.constant 0 : i32
    %c0_i32_0 = arith.constant 0 : i32
    %c0_i32_1 = arith.constant 0 : i32
    return %c0_i32, %c0_i32_0 : i32, i32
  }
  func.func @transform_8(%arg0: i32, %arg1: i32) -> (i32, i32) {
    %c0_i32 = arith.constant 0 : i32
    %c0_i32_0 = arith.constant 0 : i32
    %c0_i32_1 = arith.constant 0 : i32
    return %c0_i32, %c0_i32_0 : i32, i32
  }
  func.func @transform_9(%arg0: i32, %arg1: i32) -> (i32, i32) {
    %c0_i32 = arith.constant 0 : i32
    %c0_i32_0 = arith.constant 0 : i32
    %c0_i32_1 = arith.constant 0 : i32
    return %c0_i32, %c0_i32_0 : i32, i32
  }
  func.func @transform_10(%arg0: i32, %arg1: i32) -> (i32, i32) {
    %c0_i32 = arith.constant 0 : i32
    %c0_i32_0 = arith.constant 0 : i32
    %c0_i32_1 = arith.constant 0 : i32
    return %c0_i32, %c0_i32_0 : i32, i32
  }
  func.func @transform_11(%arg0: i32, %arg1: i32) -> (i32, i32) {
    %c0_i32 = arith.constant 0 : i32
    %c0_i32_0 = arith.constant 0 : i32
    return %arg0, %c0_i32 : i32, i32
  }
  func.func @transform_12(%arg0: i32, %arg1: i32) -> (i32, i32) {
    %c0_i32 = arith.constant 0 : i32
    %c0_i32_0 = arith.constant 0 : i32
    return %arg0, %c0_i32 : i32, i32
  }
}

</mosaic_0001>

<bundles_post_ra>
// kernel: tpu_custom_call.1
= control target key start
LH: loop header
LB: loop body
LE: loop exit
PB: predicated region body
PF: predicated region fallthrough
CT: control target
= control target key end

     0   :  { %18 = vsyncpa [#allocation7], 0  ;;  %s2627_s0 = inlined_call_operand.hbm [shape: f32[8,32], index: 0, kind: input, shape index: {}]   ;;  %s2628_s1 = inlined_call_operand.hbm [shape: f32[8,32], index: 1, kind: input, shape index: {}]   ;;  %s2629_s2 = inlined_call_operand.hbm [shape: f32[8,32], index: 2, kind: input, shape index: {}]   ;;  %s2630_s3 = inlined_call_operand.vmem [shape: f32[8,32], index: 3, kind: input, shape index: {}]   ;;  %s2631_s4 = inlined_call_operand.hbm [shape: f32[32,32], index: 4, kind: input, shape index: {}]   ;;  %s2632_s5 = inlined_call_operand.hbm [shape: f32[32,32], index: 5, kind: input, shape index: {}]   ;;  %s2633_s6 = inlined_call_operand.hbm [shape: f32[32,64], index: 6, kind: input, shape index: {}]   ;;  %s2634_s7 = inlined_call_operand.hbm [shape: f32[32,64], index: 7, kind: input, shape index: {}]   ;;  %s2635_s8 = inlined_call_operand.hbm [shape: f32[64,64], index: 8, kind: input, shape index: {}]   ;;  %s2636_s9 = inlined_call_operand.vmem [shape: f32[2,64], index: 9, kind: input, shape index: {}]   ;;  %s2637_s10 = inlined_call_operand.vmem [shape: f32[1,2], index: 10, kind: input, shape index: {}]   ;;  %s2638_s11 = inlined_call_operand.hbm [shape: f32[8,64], index: 11, kind: output, shape index: {0}]   ;;  %s2639_s12 = inlined_call_operand.vmem [shape: f32[8,2], index: 12, kind: output, shape index: {1}]  }
   0x1   :  { %19 = vsyncpa [#allocation10], 0 }
   0x2   :  { %20 = vsyncpa [#allocation13], 0 }
   0x3   :  { %21 = vsyncpa [#allocation16], 0 }
   0x4   :  { %22 = vsyncpa [#allocation19], 0 }
   0x5   :  { %23 = vsyncpa [#allocation8], 0  ;;  %s2207_s21 = smov [#allocation9]   ;;  %s2208_s23 = smov [#allocation12]  }
   0x6   :  { %s40_s22 = sshll.u32 %s2207_s21, 4  ;;  %s61_s24 = sshll.u32 %s2208_s23, 4  ;;  %s41_s22 = int_to_ptr.vmem [resolvable:$true] %s40_s22  ;;  %s2291_s24 = int_to_ptr.vmem [resolvable:$true] %s61_s24 }
   0x7   :  { %s1997_s27 = scalar_lea.hbm %s2628_s1, 128 }
   0x8   :  { %p1998_p0 = scmp.ne.s32.totalorder %s2628_s1, %s1997_s27  ;;  %p2001_p1 = scmp.lt.u32.totalorder %s1997_s27, %s2628_s1 }
   0xa   :  { %p2003_p2 = pnand %p2001_p1, %p1998_p0 }
   0xc   :  { %2006 = shalt.err (!%p2003_p2)
}
   0xd   :  { %s2007_s14 = scalar_lea.vmem %s41_s22, 128  ;;  %p2012_p4 = scmp.lt.s32.totalorder %s41_s22, %s41_s22 }
   0xe   :  { %p2008_p3 = scmp.ne.s32.totalorder %s41_s22, %s2007_s14  ;;  %p2013_p5 = scmp.lt.s32.totalorder %s2007_s14, %s2007_s14 }
  0x10   :  { %p2014_p6 = por %p2013_p5, %p2012_p4 }
  0x12   :  { %p2015_p7 = pnand %p2014_p6, %p2008_p3 }
  0x14   :  { %2018 = shalt.err (!%p2015_p7)
}
  0x15   :  { %43 = dma.hbm_to_vmem [thread:$0]  %s2628_s1, 128, %s41_s22, [#allocation10]  }
  0x16   :  { %s2019_s19 = scalar_lea.hbm %s2631_s4, 512 }
  0x17   :  { %p2020_p8 = scmp.ne.s32.totalorder %s2631_s4, %s2019_s19  ;;  %p2023_p9 = scmp.lt.u32.totalorder %s2019_s19, %s2631_s4 }
  0x19   :  { %p2025_p10 = pnand %p2023_p9, %p2020_p8 }
  0x1b   :  { %2028 = shalt.err (!%p2025_p10)
}
  0x1c   :  { %s2029_s26 = scalar_lea.vmem %s2291_s24, 512  ;;  %p2034_p12 = scmp.lt.s32.totalorder %s2291_s24, %s2291_s24 }
  0x1d   :  { %p2030_p11 = scmp.ne.s32.totalorder %s2291_s24, %s2029_s26  ;;  %p2035_p13 = scmp.lt.s32.totalorder %s2029_s26, %s2029_s26 }
  0x1f   :  { %p2036_p0 = por %p2035_p13, %p2034_p12 }
  0x21   :  { %p2037_p1 = pnand %p2036_p0, %p2030_p11 }
  0x23   :  { %2040 = shalt.err (!%p2037_p1)
}
  0x24   :  { %s2209_s1 = smov 128   ;;  %s2210_s22 = smov 8  }
  0x25   :  { %67 = dma.hbm_to_vmem [thread:$0]  %s2631_s4, 512, %s2291_s24, [#allocation13], %s2209_s1, %s2209_s1, %s2210_s22  }
  0x26   :  { %s2211_s29 = smov [#allocation15]   ;;  %s2212_s13 = smov [#allocation6]  }
  0x27   :  { %s85_s30 = sshll.u32 %s2211_s29, 4  ;;  %s30_s14 = sshll.u32 %s2212_s13, 4  ;;  %s86_s30 = int_to_ptr.vmem [resolvable:$true] %s85_s30  ;;  %s31_s14 = int_to_ptr.vmem [resolvable:$true] %s30_s14 }
  0x28   :  { %s2041_s17 = scalar_lea.hbm %s2633_s6, 512 }
  0x29   :  { %p2042_p2 = scmp.ne.s32.totalorder %s2633_s6, %s2041_s17  ;;  %p2045_p3 = scmp.lt.u32.totalorder %s2041_s17, %s2633_s6 }
  0x2b   :  { %p2047_p4 = pnand %p2045_p3, %p2042_p2 }
  0x2d   :  { %2050 = shalt.err (!%p2047_p4)
}
  0x2e   :  { %s2051_s4 = scalar_lea.vmem %s86_s30, 512  ;;  %p2056_p6 = scmp.lt.s32.totalorder %s86_s30, %s86_s30 }
  0x2f   :  { %p2052_p5 = scmp.ne.s32.totalorder %s86_s30, %s2051_s4  ;;  %p2057_p7 = scmp.lt.s32.totalorder %s2051_s4, %s2051_s4 }
  0x31   :  { %p2058_p8 = por %p2057_p7, %p2056_p6 }
  0x33   :  { %p2059_p9 = pnand %p2058_p8, %p2052_p5 }
  0x35   :  { %2062 = shalt.err (!%p2059_p9)
}
  0x36   :  { %91 = dma.hbm_to_vmem [thread:$0]  %s2633_s6, 512, %s86_s30, [#allocation16], %s2209_s1, %s2209_s1, %s2210_s22  }
  0x37   :  { %s2063_s27 = scalar_lea.hbm %s2627_s0, 128 }
  0x38   :  { %p2064_p10 = scmp.ne.s32.totalorder %s2627_s0, %s2063_s27  ;;  %p2067_p11 = scmp.lt.u32.totalorder %s2063_s27, %s2627_s0 }
  0x3a   :  { %p2069_p12 = pnand %p2067_p11, %p2064_p10 }
  0x3c   :  { %2072 = shalt.err (!%p2069_p12)
}
  0x3d   :  { %s2073_s16 = scalar_lea.vmem %s31_s14, 128  ;;  %p2078_p0 = scmp.lt.s32.totalorder %s31_s14, %s31_s14 }
  0x3e   :  { %p2074_p13 = scmp.ne.s32.totalorder %s31_s14, %s2073_s16  ;;  %p2079_p1 = scmp.lt.s32.totalorder %s2073_s16, %s2073_s16 }
  0x40   :  { %p2080_p2 = por %p2079_p1, %p2078_p0 }
  0x42   :  { %p2081_p3 = pnand %p2080_p2, %p2074_p13 }
  0x44   :  { %2084 = shalt.err (!%p2081_p3)
}
  0x45   :  { %33 = dma.hbm_to_vmem [thread:$0]  %s2627_s0, 128, %s31_s14, [#allocation7]  }
  0x46   :  { %s2213_s17 = smov [#allocation11]   ;;  %s2214_s19 = smov [#allocation14]  }
  0x47   :  { %s50_s18 = sshll.u32 %s2213_s17, 4  ;;  %s73_s20 = sshll.u32 %s2214_s19, 4  ;;  %s51_s18 = int_to_ptr.vmem [resolvable:$true] %s50_s18  ;;  %s2352_s20 = int_to_ptr.vmem [resolvable:$true] %s73_s20 }
  0x48   :  { %s2085_s24 = scalar_lea.hbm %s2629_s2, 128 }
  0x49   :  { %p2086_p4 = scmp.ne.s32.totalorder %s2629_s2, %s2085_s24  ;;  %p2089_p5 = scmp.lt.u32.totalorder %s2085_s24, %s2629_s2 }
  0x4b   :  { %p2091_p6 = pnand %p2089_p5, %p2086_p4 }
  0x4d   :  { %2094 = shalt.err (!%p2091_p6)
}
  0x4e   :  { %s2095_s0 = scalar_lea.vmem %s51_s18, 128  ;;  %p2100_p8 = scmp.lt.s32.totalorder %s51_s18, %s51_s18 }
  0x4f   :  { %p2096_p7 = scmp.ne.s32.totalorder %s51_s18, %s2095_s0  ;;  %p2101_p9 = scmp.lt.s32.totalorder %s2095_s0, %s2095_s0 }
  0x51   :  { %p2102_p10 = por %p2101_p9, %p2100_p8 }
  0x53   :  { %p2103_p11 = pnand %p2102_p10, %p2096_p7 }
  0x55   :  { %2106 = shalt.err (!%p2103_p11)
}
  0x56   :  { %53 = dma.hbm_to_vmem [thread:$0]  %s2629_s2, 128, %s51_s18, [#allocation10]  }
  0x57   :  { %s2107_s15 = scalar_lea.hbm %s2632_s5, 512 }
  0x58   :  { %p2108_p12 = scmp.ne.s32.totalorder %s2632_s5, %s2107_s15  ;;  %p2111_p13 = scmp.lt.u32.totalorder %s2107_s15, %s2632_s5 }
  0x5a   :  { %p2113_p0 = pnand %p2111_p13, %p2108_p12 }
  0x5c   :  { %2116 = shalt.err (!%p2113_p0)
}
  0x5d   :  { %s2117_s19 = scalar_lea.vmem %s2352_s20, 512  ;;  %p2122_p2 = scmp.lt.s32.totalorder %s2352_s20, %s2352_s20 }
  0x5e   :  { %p2118_p1 = scmp.ne.s32.totalorder %s2352_s20, %s2117_s19  ;;  %p2123_p3 = scmp.lt.s32.totalorder %s2117_s19, %s2117_s19 }
  0x60   :  { %p2124_p4 = por %p2123_p3, %p2122_p2 }
  0x62   :  { %p2125_p5 = pnand %p2124_p4, %p2118_p1 }
  0x64   :  { %2128 = shalt.err (!%p2125_p5)
}
  0x65   :  { %79 = dma.hbm_to_vmem [thread:$0]  %s2632_s5, 512, %s2352_s20, [#allocation13], %s2209_s1, %s2209_s1, %s2210_s22  }
  0x66   :  { %s2215_s21 = smov [#allocation17]   ;;  %s2216_s24 = smov [#allocation18]  }
  0x67   :  { %s97_s4 = sshll.u32 %s2215_s21, 4  ;;  %s109_s23 = sshll.u32 %s2216_s24, 4  ;;  %s98_s4 = int_to_ptr.vmem [resolvable:$true] %s97_s4  ;;  %s2386_s23 = int_to_ptr.vmem [resolvable:$true] %s109_s23 }
  0x68   :  { %s2129_s27 = scalar_lea.hbm %s2634_s7, 512 }
  0x69   :  { %p2130_p6 = scmp.ne.s32.totalorder %s2634_s7, %s2129_s27  ;;  %p2133_p7 = scmp.lt.u32.totalorder %s2129_s27, %s2634_s7 }
  0x6b   :  { %p2135_p8 = pnand %p2133_p7, %p2130_p6 }
  0x6d   :  { %2138 = shalt.err (!%p2135_p8)
}
  0x6e   :  { %s2139_s5 = scalar_lea.vmem %s98_s4, 512  ;;  %p2144_p10 = scmp.lt.s32.totalorder %s98_s4, %s98_s4 }
  0x6f   :  { %p2140_p9 = scmp.ne.s32.totalorder %s98_s4, %s2139_s5  ;;  %p2145_p11 = scmp.lt.s32.totalorder %s2139_s5, %s2139_s5 }
  0x71   :  { %p2146_p12 = por %p2145_p11, %p2144_p10 }
  0x73   :  { %p2147_p13 = pnand %p2146_p12, %p2140_p9 }
  0x75   :  { %2150 = shalt.err (!%p2147_p13)
}
  0x76   :  { %103 = dma.hbm_to_vmem [thread:$0]  %s2634_s7, 512, %s98_s4, [#allocation16], %s2209_s1, %s2209_s1, %s2210_s22  }
  0x77   :  { %s2151_s6 = scalar_lea.hbm %s2635_s8, 1024 }
  0x78   :  { %p2152_p0 = scmp.ne.s32.totalorder %s2635_s8, %s2151_s6  ;;  %p2155_p1 = scmp.lt.u32.totalorder %s2151_s6, %s2635_s8 }
  0x7a   :  { %p2157_p2 = pnand %p2155_p1, %p2152_p0 }
  0x7c   :  { %2160 = shalt.err (!%p2157_p2)
}
  0x7d   :  { %s2161_s18 = scalar_lea.vmem %s2386_s23, 1024  ;;  %p2166_p4 = scmp.lt.s32.totalorder %s2386_s23, %s2386_s23 }
  0x7e   :  { %p2162_p3 = scmp.ne.s32.totalorder %s2386_s23, %s2161_s18  ;;  %p2167_p5 = scmp.lt.s32.totalorder %s2161_s18, %s2161_s18 }
  0x80   :  { %p2168_p6 = por %p2167_p5, %p2166_p4 }
  0x82   :  { %p2169_p7 = pnand %p2168_p6, %p2162_p3 }
  0x84   :  { %2172 = shalt.err (!%p2169_p7)
}
  0x85   :  { %115 = dma.hbm_to_vmem [thread:$0]  %s2635_s8, 1024, %s2386_s23, [#allocation19], %s2209_s1, %s2209_s1, %s2210_s22  }
  0x86   :  { %2195 = dma.done.wait [#allocation7], 128  }
  0x87   :  { %2196 = vsyncadd [#allocation7], 4294967168 }
  0x88   :  { %2197 = dma.done.wait [#allocation10], 256  }
  0x89   :  { %2198 = vsyncadd [#allocation10], 4294967040 }
  0x8a   :  { %2199 = dma.done.wait [#allocation13], 1024  }
  0x8b   :  { %2200 = vsyncadd [#allocation13], 4294966272 }
  0x8c   :  { %2201 = dma.done.wait [#allocation16], 1024  }
  0x8d   :  { %2202 = vsyncadd [#allocation16], 4294966272 }
  0x8e   :  { %2203 = dma.done.wait [#allocation19], 1024  }
  0x8f   :  { %2204 = vsyncadd [#allocation19], 4294966272  ;;  %v2217_v0 = vmov 0.0|0.0   ;;  %vm2218_vm0 = vmmov 0   ;;  %v2219_v1 = vmov 0.0   ;;  %v149_v2 = vld [vmem:[#allocation12] sm:$0xff] }
  0x90   :  { %1906 = vmatprep.subr.bf16.mxu1 %v2217_v0  ;;  %1918 = vmatprep.subr.bf16.mxu0 %v2217_v0  ;;  %v150_v3 = vld [vmem:[#allocation12 + $0x8] sm:$0xff]  ;;  %v327_v4 = vld [vmem:[#allocation15] sm:$0xff]  ;;  %v151_v7 = vld [vmem:[#allocation12 + $0x10] sm:$0xff]  ;;  %vm153_vm1 = vcmask 261120   ;;  %vm308_vm2 = vcmask 130048   ;;  %vm563_vm3 = vcmask 64512  }
  0x91   :  { %1797 = vmatprep.mubr.msk.f32.mxu1 %vm2218_vm0, %v2219_v1  ;;  %1819 = vmatprep.mubr.msk.f32.mxu0 %vm2218_vm0, %v2219_v1  ;;  %v1907_v5 = vpack.c.bf16 %v150_v3, %v149_v2  ;;  %v328_v6 = vld [vmem:[#allocation15 + $0x8] sm:$0xff]  ;;  %v152_v8 = vld [vmem:[#allocation12 + $0x18] sm:$0xff]  ;;  %v329_v10 = vld [vmem:[#allocation15 + $0x10] sm:$0xff]  ;;  %309 = vst.msk [vmem:[#allocation3] sm:$0xff] %vm308_vm2, %v2219_v1  ;;  %vm313_vm4 = vcmask 7168   ;;  %v2221_v47 = vmov -inf  }
  0x92   :  { %v1919_v9 = vpack.c.bf16 %v328_v6, %v327_v4  ;;  %v330_v11 = vld [vmem:[#allocation15 + $0x18] sm:$0xff]  ;;  %v1910_v12 = vpack.c.bf16 %v152_v8, %v151_v7  ;;  %v229_v14 = vld [vmem:[#allocation14] sm:$0xff]  ;;  %v230_v15 = vld [vmem:[#allocation14 + $0x8] sm:$0xff]  ;;  %310 = vst.msk [vmem:[#allocation3 + $0x8] sm:$0xff] %vm308_vm2, %v2219_v1  ;;  %v2222_v48 = vmov 0   ;;  %s2223_s22 = smov 96  }
  0x93   :  { %1908 = vmatpush3.bf16.msra.mxu1 %v1907_v5  ;;  %v1922_v13 = vpack.c.bf16 %v330_v11, %v329_v10  ;;  %v148_v16 = vld [vmem:[#allocation6] sm:$0xff]  ;;  %v1913_v17 = vpack.c.bf16 %v230_v15, %v229_v14  ;;  %v326_v18 = vld [vmem:[%s2630_s3] sm:$0xff]  ;;  %v231_v19 = vld [vmem:[#allocation14 + $0x10] sm:$0xff]  ;;  %311 = vst.msk [vmem:[#allocation3 + $0x10] sm:$0xff] %vm308_vm2, %v2219_v1  ;;  %s2220_s3 = smov 112   ;;  %1967 = vset.pattern.permute.xlu1 %v2222_v48  ;;  %s2224_s4 = smov 80  }
  0x94   :  { %1909 = vmatprep.subr.bf16.mxu1 %v2217_v0  ;;  %1920 = vmatpush3.bf16.msra.mxu0 %v1919_v9  ;;  %v232_v20 = vld [vmem:[#allocation14 + $0x18] sm:$0xff]  ;;  %v405_v22 = vld [vmem:[#allocation17] sm:$0xff]  ;;  %v406_v23 = vld [vmem:[#allocation17 + $0x8] sm:$0xff]  ;;  %312 = vst.msk [vmem:[#allocation3 + $0x18] sm:$0xff] %vm308_vm2, %v2219_v1  ;;  %vm1586_vm5 = vcmask 523264   ;;  %vm1686_vm6 = vcmask 15360  }
  0x95   :  { %1921 = vmatprep.subr.bf16.mxu0 %v2217_v0  ;;  %v1916_v21 = vpack.c.bf16 %v232_v20, %v231_v19  ;;  %v228_v24 = vld [vmem:[#allocation9] sm:$0xff]  ;;  %v1925_v25 = vpack.c.bf16 %v406_v23, %v405_v22  ;;  %v408_v27 = vld [vmem:[#allocation17 + $0x18] sm:$0xff]  ;;  %314 = vst.msk [vmem:[#allocation4] sm:$0xff] %vm313_vm4, %v2221_v47  ;;  %315 = vst.msk [vmem:[#allocation4 + $0x8] sm:$0xff] %vm313_vm4, %v2221_v47  ;;  %1968 = vset.pattern.permute.xlu0 %v2222_v48  ;;  %s2225_s26 = smov [#allocation20]  }
  0x96   :  { %v407_v26 = vld [vmem:[#allocation17 + $0x10] sm:$0xff]  ;;  %v324_v29 = vld [vmem:[#allocation11] sm:$0xff]  ;;  %316 = vst.msk [vmem:[#allocation4 + $0x10] sm:$0xff] %vm313_vm4, %v2221_v47  ;;  %317 = vst.msk [vmem:[#allocation4 + $0x18] sm:$0xff] %vm313_vm4, %v2221_v47  ;;  %s1699_s27 = sshll.u32 %s2225_s26, 4  ;;  %s1700_s27 = int_to_ptr.vmem [resolvable:$true] %s1699_s27 }
  0x97   :  { %1911 = vmatpush3.bf16.msra.mxu1 %v1910_v12  ;;  %v1928_v28 = vpack.c.bf16 %v408_v27, %v407_v26  ;;  %318 = vst.msk [vmem:[#allocation5] sm:$0xff] %vm313_vm4, %v2219_v1  ;;  %319 = vst.msk [vmem:[#allocation5 + $0x8] sm:$0xff] %vm313_vm4, %v2219_v1  ;;  %v1266_v47 = vld [vmem:[#allocation18 + $0x10] sm:$0xff]  ;;  %v1267_v48 = vld [vmem:[#allocation18 + $0x18] sm:$0xff]  ;;  %p2178_p9 = scmp.lt.s32.totalorder %s1700_s27, %s1700_s27 }
  0x98   :  { %1912 = vmatprep.subr.bf16.mxu1 %v2217_v0  ;;  %1923 = vmatpush3.bf16.msra.mxu0 %v1922_v13  ;;  %320 = vst.msk [vmem:[#allocation5 + $0x10] sm:$0xff] %vm313_vm4, %v2219_v1  ;;  %321 = vst.msk [vmem:[#allocation5 + $0x18] sm:$0xff] %vm313_vm4, %v2219_v1 }
  0x99   :  { %1833 = vmatprep.subr.mxu0 %v2219_v1 }
  0x9a   :  { %1798 = vmatmul.mubr.msk.f32.vlgmr.msra.gmra.mrb[0].mxu1 %vm153_vm1, %v148_v16 }
  0x9b   :  { %1914 = vmatpush3.bf16.msra.mxu1 %v1913_v17  ;;  %1820 = vmatmul.mubr.msk.f32.vlgmr.msra.gmra.mrb[0].mxu0 %vm153_vm1, %v326_v18 }
  0x9c   :  { %1915 = vmatprep.subr.bf16.mxu1 %v2217_v0  ;;  %1808 = vmatprep.mubr.msk.f32.mxu1 %vm2218_vm0, %v2219_v1  ;;  %v2506_v58 = vld [vmem:[#allocation4] sm:$0xff]  ;;  %v2517_v62 = vld [vmem:[#allocation4 + $0x8] sm:$0xff] }
  0x9d   :  { %1835 = vmatprep.mubr.msk.f32.mxu0 %vm2218_vm0, %v2219_v1  ;;  %v2522_v3 = vld [vmem:[#allocation4 + $0x10] sm:$0xff]  ;;  %v2537_v8 = vld [vmem:[#allocation4 + $0x18] sm:$0xff] }
  0x9f   :  { %1917 = vmatpush3.bf16.msra.mxu1 %v1916_v21 }
  0xa0   :  { %1924 = vmatprep.subr.bf16.mxu1 %v2217_v0 }
  0xa2   :  { %1809 = vmatmul.mubr.msk.f32.vlgmr.msra.gmra.mrb[2].mxu1 %vm153_vm1, %v228_v24 }
  0xa3   :  { %1926 = vmatpush3.bf16.msra.mxu1 %v1925_v25  ;;  %1830 = vmatprep.mubr.msk.f32.mxu1 %vm2218_vm0, %v2219_v1 }
  0xa4   :  { %1927 = vmatprep.subr.bf16.mxu1 %v2217_v0 }
  0xa7   :  { %1929 = vmatpush3.bf16.msra.mxu1 %v1928_v28 }
  0xa8   :  { %1838 = vmatprep.subr.mxu1 %v2219_v1 }
  0xaa   :  { %1831 = vmatmul.mubr.msk.f32.vlgmr.msra.gmra.mrb[4].mxu1 %vm153_vm1, %v324_v29 }
  0xab   :  { %1840 = vmatprep.mubr.msk.f32.mxu1 %vm2218_vm0, %v2219_v1 }
 0x16d   :  { %v223_v30 = vpop.f32.mrb[0].mxu1 }
 0x16e   :  { %227 = vst.msk [vmem:[#allocation2] sm:$0xff] %vm153_vm1, %v223_v30  ;;  %v1799_v31 = vpop.f32.mrb[1].mxu1  ;;  %v2461_v32 = vpop.f32.mrb[0].mxu0 }
 0x16f   :  { %v1821_v33 = vpop.f32.mrb[1].mxu0  ;;  %675 = vrot.lane.b32.xlu0 %v2461_v32, %s2220_s3  ;;  %1834 = vmatpush3.xpose.msk.msra.mxu0 %vm308_vm2, %v2461_v32 }
 0x170   :  { %1843 = vmatprep.subr.mxu0 %v2219_v1 }
 0x175   :  { %v482_v34 = vld [vmem:[#allocation2] sm:$0xff]  ;;  %v302_v35 = vpop.f32.mrb[2].mxu1 }
 0x176   :  { %673 = vrot.lane.b32.xlu0 %v482_v34, %s2220_s3  ;;  %1836 = vmatmul.mubr.msk.f32.vlgmr.msra.gmra.mrb[2].mxu0 %vm308_vm2, %v482_v34  ;;  %307 = vst.msk [vmem:[#allocation2 + $0x8] sm:$0xff] %vm153_vm1, %v302_v35  ;;  %v1810_v36 = vpop.f32.mrb[3].mxu1 }
 0x177   :  { %1845 = vmatprep.mubr.msk.f32.mxu0 %vm2218_vm0, %v2219_v1 }
 0x17d   :  { %v2471_v37 = vpop.f32.mrb[4].mxu1  ;;  %v484_v39 = vld [vmem:[#allocation2 + $0x8] sm:$0xff] }
 0x17e   :  { %1053 = vrot.lane.b32.xlu1 %v2471_v37, %s2220_s3  ;;  %v1832_v38 = vpop.f32.mrb[5].mxu1 }
 0x182   :  { %1051 = vrot.lane.b32.xlu1 %v484_v39, %s2220_s3 }
 0x1e1   :  { %v676_v40 = vpop.permute.xlu0 %675 }
 0x1e2   :  { %1844 = vmatpush3.xpose.msk.msra.mxu0 %vm308_vm2, %v676_v40  ;;  %v579_v40 = vld [vmem:[#allocation5] sm:$0xff] }
 0x1e3   :  { %1853 = vmatprep.subr.mxu0 %v2219_v1 }
 0x1e8   :  { %v674_v41 = vpop.permute.xlu0 %673 }
 0x1e9   :  { %1846 = vmatmul.mubr.msk.f32.vlgmr.msra.gmra.mrb[4].mxu0 %vm308_vm2, %v674_v41 }
 0x1ea   :  { %1854 = vmatpush3.xpose.msk.msra.mxu0 %vm308_vm2, %v2471_v37  ;;  %1855 = vmatprep.mubr.msk.f32.mxu0 %vm2218_vm0, %v2219_v1 }
 0x1eb   :  { %1863 = vmatprep.subr.mxu0 %v2219_v1 }
 0x1ed   :  { %1856 = vmatmul.mubr.msk.f32.vlgmr.msra.gmra.mrb[6].mxu0 %vm308_vm2, %v484_v39 }
 0x1ee   :  { %1865 = vmatprep.mubr.msk.f32.mxu0 %vm2218_vm0, %v2219_v1 }
 0x1f0   :  { %v1054_v42 = vpop.permute.xlu1 %1053 }
 0x1f1   :  { %1864 = vmatpush3.xpose.msk.msra.mxu0 %vm308_vm2, %v1054_v42 }
 0x1f2   :  { %1930 = vmatprep.subr.bf16.mxu0 %v2217_v0 }
 0x1f4   :  { %v1052_v43 = vpop.permute.xlu1 %1051 }
 0x1f5   :  { %1866 = vmatmul.mubr.msk.f32.vlgmr.msra.gmra.mrb[8].mxu0 %vm308_vm2, %v1052_v43 }
 0x1f6   :  { %1877 = vmatprep.mubr.msk.f32.mxu0 %vm2218_vm0, %v2219_v1 }
 0x249   :  { %v558_v44 = vpop.f32.mrb[2].mxu0 }
 0x24a   :  { %v1837_v45 = vpop.f32.mrb[3].mxu0  ;;  %v564_v46 = vsel %vm563_vm3, %v558_v44, -inf }
 0x24b   :  { %565 = vmax.xlane.f32.xlu0 %v564_v46 }
 0x2bc   :  { %v747_v49 = vpop.f32.mrb[4].mxu0 }
 0x2bd   :  { %v1847_v50 = vpop.f32.mrb[5].mxu0  ;;  %v753_v51 = vsel %vm563_vm3, %v747_v49, -inf }
 0x2be   :  { %754 = vmax.xlane.f32.xlu1 %v753_v51  ;;  %v1931_v50 = vpack.c.bf16 %v1267_v48, %v1266_v47  ;;  %v1511_v47 = vld [vmem:[#allocation18 + $0x38] sm:$0xff] }
 0x2c0   :  { %v935_v52 = vpop.f32.mrb[6].mxu0  ;;  %1932 = vmatpush3.bf16.msra.mxu0 %v1931_v50 }
 0x2c1   :  { %v1857_v53 = vpop.f32.mrb[7].mxu0  ;;  %v941_v54 = vsel %vm563_vm3, %v935_v52, -inf  ;;  %1933 = vmatprep.subr.bf16.mxu0 %v2217_v0 }
 0x2c2   :  { %942 = vmax.xlane.f32.xlu0 %v941_v54  ;;  %v769_v53 = vld [vmem:[#allocation5 + $0x8] sm:$0xff] }
 0x2c8   :  { %v1125_v55 = vpop.f32.mrb[8].mxu0 }
 0x2c9   :  { %v1131_v56 = vsel %vm563_vm3, %v1125_v55, -inf  ;;  %v1867_v57 = vpop.f32.mrb[9].mxu0 }
 0x2ca   :  { %1132 = vmax.xlane.f32.xlu0 %v1131_v56  ;;  %v957_v57 = vld [vmem:[#allocation5 + $0x10] sm:$0xff] }
 0x2d8   :  { %v566_v59 = vpop.xlane.xlu0 %565 }
 0x2d9   :  { %v2509_v60 = vmax.f32 %v2506_v58, %v566_v59 }
 0x2db   :  { %v568_v61 = vsub.f32 %v2506_v58, %v2509_v60  ;;  %672 = vst.msk [vmem:[#allocation4] sm:$0xff] %vm313_vm4, %v2509_v60  ;;  %573 = vperm.xlu1 %1967, %v2509_v60  }
 0x2dd   :  { %v569_v36 = vmul.f32 1.442695, %v568_v61 }
 0x2df   :  { %594 = vrot.lane.b32.xlu1 %v2461_v32, %s2223_s22 }
 0x34b   :  { %v755_v63 = vpop.xlane.xlu1 %754 }
 0x34c   :  { %v2520_v2 = vmax.f32 %v2517_v62, %v755_v63  ;;  %v1147_v63 = vld [vmem:[#allocation5 + $0x18] sm:$0xff] }
 0x34e   :  { %v757_v4 = vsub.f32 %v2517_v62, %v2520_v2  ;;  %862 = vst.msk [vmem:[#allocation4 + $0x8] sm:$0xff] %vm313_vm4, %v2520_v2  ;;  %762 = vperm.xlu0 %1968, %v2520_v2  }
 0x34f   :  { %v943_v5 = vpop.xlane.xlu0 %942 }
 0x350   :  { %v2530_v6 = vmax.f32 %v2522_v3, %v943_v5  ;;  %v758_v34 = vmul.f32 1.442695, %v757_v4 }
 0x352   :  { %v945_v7 = vsub.f32 %v2522_v3, %v2530_v6  ;;  %1050 = vst.msk [vmem:[#allocation4 + $0x10] sm:$0xff] %vm313_vm4, %v2530_v6  ;;  %950 = vperm.xlu1 %1967, %v2530_v6  }
 0x354   :  { %v946_v51 = vmul.f32 1.442695, %v945_v7  ;;  %v587_v7 = vld [vmem:[#allocation3] sm:$0xff] }
 0x356   :  { %784 = vrot.lane.b32.xlu1 %v2461_v32, %s2224_s4 }
 0x357   :  { %v1133_v9 = vpop.xlane.xlu0 %1132 }
 0x358   :  { %v2541_v10 = vmax.f32 %v2537_v8, %v1133_v9 }
 0x35a   :  { %v1135_v11 = vsub.f32 %v2537_v8, %v2541_v10  ;;  %1240 = vst.msk [vmem:[#allocation4 + $0x18] sm:$0xff] %vm313_vm4, %v2541_v10  ;;  %v574_v12 = vpop.permute.xlu1 %573  ;;  %1140 = vperm.xlu1 %1967, %v2541_v10  }
 0x35b   :  { %v576_v13 = vsub.f32 %v558_v44, %v574_v12 }
 0x35d   :  { %v577_v14 = vmul.f32 1.442695, %v576_v13 }
 0x35e   :  { %v595_v15 = vpop.permute.xlu1 %594  ;;  %972 = vrot.lane.b32.xlu1 %v2471_v37, %s2223_s22 }
 0x35f   :  { %1969 = vpow2.f32 %v577_v14  ;;  %1839 = vmatpush3.msra.mxu1 %v595_v15  ;;  %v1588_v15 = vld [vmem:[%s2636_s9] sm:$0x3] }
 0x360   :  { %1848 = vmatprep.subr.mxu1 %v2219_v1 }
 0x362   :  { %1162 = vrot.lane.b32.xlu1 %v2471_v37, %s2224_s4 }
 0x369   :  { %v1970_v16 = vpop.eup %1969 }
 0x36a   :  { %1841 = vmatmul.mubr.msk.f32.vlgmr.msra.gmra.mrb[6].mxu1 %vm563_vm3, %v1970_v16  ;;  %v581_v17 = vsel %vm563_vm3, %v1970_v16, 0.0  ;;  %v777_v16 = vld [vmem:[#allocation3 + $0x8] sm:$0xff] }
 0x36b   :  { %1850 = vmatprep.mubr.msk.f32.mxu1 %vm2218_vm0, %v2219_v1 }
 0x36d   :  { %582 = vadd.xlane.f32.xlu0 %v581_v17 }
 0x3cd   :  { %v763_v18 = vpop.permute.xlu0 %762 }
 0x3ce   :  { %v765_v19 = vsub.f32 %v747_v49, %v763_v18 }
 0x3d0   :  { %v766_v20 = vmul.f32 1.442695, %v765_v19 }
 0x3d1   :  { %v951_v21 = vpop.permute.xlu1 %950 }
 0x3d2   :  { %1971 = vpow2.f32 %v766_v20  ;;  %v953_v22 = vsub.f32 %v935_v52, %v951_v21  ;;  %v1136_v52 = vmul.f32 1.442695, %v1135_v11 }
 0x3d4   :  { %v954_v23 = vmul.f32 1.442695, %v953_v22 }
 0x3d5   :  { %v785_v24 = vpop.permute.xlu1 %784 }
 0x3d6   :  { %1973 = vpow2.f32 %v954_v23  ;;  %1849 = vmatpush3.msra.mxu1 %v785_v24 }
 0x3d7   :  { %1858 = vmatprep.subr.mxu1 %v2219_v1 }
 0x3d9   :  { %v1141_v25 = vpop.permute.xlu1 %1140 }
 0x3da   :  { %v1143_v26 = vsub.f32 %v1125_v55, %v1141_v25 }
 0x3dc   :  { %v1972_v27 = vpop.eup %1971  ;;  %v1144_v28 = vmul.f32 1.442695, %v1143_v26  ;;  %v1254_v26 = vld [vmem:[#allocation18] sm:$0xff] }
 0x3dd   :  { %v973_v29 = vpop.permute.xlu1 %972  ;;  %1851 = vmatmul.mubr.msk.f32.vlgmr.msra.gmra.mrb[8].mxu1 %vm563_vm3, %v1972_v27  ;;  %v771_v30 = vsel %vm563_vm3, %v1972_v27, 0.0  ;;  %v1255_v27 = vld [vmem:[#allocation18 + $0x8] sm:$0xff] }
 0x3de   :  { %1975 = vpow2.f32 %v1144_v28  ;;  %1859 = vmatpush3.msra.mxu1 %v973_v29  ;;  %772 = vadd.xlane.f32.xlu1 %v771_v30  ;;  %v1934_v30 = vpack.c.bf16 %v1255_v27, %v1254_v26 }
 0x3df   :  { %1860 = vmatprep.mubr.msk.f32.mxu1 %vm2218_vm0, %v2219_v1  ;;  %1868 = vmatprep.subr.mxu1 %v2219_v1  ;;  %1977 = vpow2.f32 %v758_v34 }
 0x3e0   :  { %v1974_v31 = vpop.eup %1973  ;;  %1979 = vpow2.f32 %v569_v36  ;;  %v1425_v36 = vld [vmem:[#allocation18 + $0x28] sm:$0xff] }
 0x3e1   :  { %v1163_v32 = vpop.permute.xlu1 %1162  ;;  %1861 = vmatmul.mubr.msk.f32.vlgmr.msra.gmra.mrb[10].mxu1 %vm563_vm3, %v1974_v31  ;;  %v959_v33 = vsel %vm563_vm3, %v1974_v31, 0.0 }
 0x3e2   :  { %1869 = vmatpush3.msra.mxu1 %v1163_v32  ;;  %960 = vadd.xlane.f32.xlu1 %v959_v33  ;;  %v965_v32 = vld [vmem:[#allocation3 + $0x10] sm:$0xff] }
 0x3e3   :  { %1870 = vmatprep.mubr.msk.f32.mxu1 %vm2218_vm0, %v2219_v1  ;;  %1901 = vmatprep.subr.mxu1 %v2219_v1 }
 0x3e8   :  { %v1976_v35 = vpop.eup %1975 }
 0x3e9   :  { %1871 = vmatmul.mubr.msk.f32.vlgmr.msra.gmra.mrb[12].mxu1 %vm563_vm3, %v1976_v35  ;;  %v1149_v37 = vsel %vm563_vm3, %v1976_v35, 0.0  ;;  %v1978_v38 = vpop.eup %1977  ;;  %v1424_v35 = vld [vmem:[#allocation18 + $0x20] sm:$0xff] }
 0x3ea   :  { %1150 = vadd.xlane.f32.xlu0 %v1149_v37  ;;  %1903 = vmatprep.mubr.msk.f32.mxu1 %vm2218_vm0, %v2219_v1  ;;  %v1980_v39 = vpop.eup %1979  ;;  %v770_v54 = vmul.f32 %v1978_v38, %v769_v53 }
 0x3eb   :  { %v580_v41 = vmul.f32 %v1980_v39, %v579_v40  ;;  %1902 = vmatpush3.xpose.msk.msra.mxu1 %vm1586_vm5, %v1588_v15 }
 0x3f3   :  { %780 = vperm.xlu1 %1967, %v1978_v38   ;;  %v1155_v38 = vld [vmem:[#allocation3 + $0x18] sm:$0xff] }
 0x3fa   :  { %v583_v42 = vpop.xlane.xlu0 %582 }
 0x3fb   :  { %v584_v43 = vadd.f32 %v583_v42, %v580_v41  ;;  %v1937_v42 = vpack.c.bf16 %v1425_v36, %v1424_v35 }
 0x3fd   :  { %586 = vst.msk [vmem:[#allocation5] sm:$0xff] %vm313_vm4, %v584_v43 }
 0x400   :  { %590 = vperm.xlu0 %1968, %v1980_v39  }
 0x404   :  { %v1245_v44 = vld [vmem:[#allocation5] sm:$0xff] }
 0x405   :  { %1981 = vrcp.f32 %v1245_v44 }
 0x406   :  { %1983 = vpow2.f32 %v946_v51 }
 0x407   :  { %1985 = vpow2.f32 %v1136_v52 }
 0x40f   :  { %v1982_v45 = vpop.eup %1981 }
 0x410   :  { %1250 = vperm.xlu0 %1968, %v1982_v45   ;;  %v1984_v55 = vpop.eup %1983 }
 0x411   :  { %v958_v59 = vmul.f32 %v1984_v55, %v957_v57  ;;  %v1986_v62 = vpop.eup %1985 }
 0x412   :  { %v1148_v3 = vmul.f32 %v1986_v62, %v1147_v63 }
 0x43d   :  { %v666_v46 = vpop.f32.mrb[6].mxu1 }
 0x43e   :  { %v1842_v49 = vpop.f32.mrb[7].mxu1 }
 0x46b   :  { %v773_v56 = vpop.xlane.xlu1 %772 }
 0x46c   :  { %v774_v58 = vadd.f32 %v773_v56, %v770_v54 }
 0x46e   :  { %775 = vst.msk [vmem:[#allocation5 + $0x8] sm:$0xff] %vm313_vm4, %v774_v58  ;;  %v1738_v58 = vld [vmem:[%s2637_s10] ss:$0 sm:$0xff]  ;;  %s2173_s10 = scalar_lea.vmem %s1700_s27, 128 }
 0x46f   :  { %v961_v60 = vpop.xlane.xlu1 %960  ;;  %p2174_p8 = scmp.ne.s32.totalorder %s1700_s27, %s2173_s10  ;;  %p2179_p10 = scmp.lt.s32.totalorder %s2173_s10, %s2173_s10 }
 0x470   :  { %v962_v61 = vadd.f32 %v961_v60, %v958_v59 }
 0x471   :  { %p2180_p11 = por %p2179_p10, %p2178_p9 }
 0x472   :  { %963 = vst.msk [vmem:[#allocation5 + $0x10] sm:$0xff] %vm313_vm4, %v962_v61 }
 0x473   :  { %v781_v17 = vpop.permute.xlu1 %780  ;;  %p2181_p12 = pnand %p2180_p11, %p2174_p8 }
 0x474   :  { %v783_v18 = vmul.f32 %v781_v17, %v777_v16 }
 0x475   :  { %v1257_v2 = vld [vmem:[#allocation5 + $0x8] sm:$0xff] }
 0x476   :  { %1987 = vrcp.f32 %v1257_v2 }
 0x477   :  { %v1151_v4 = vpop.xlane.xlu0 %1150 }
 0x478   :  { %v1152_v5 = vadd.f32 %v1151_v4, %v1148_v3 }
 0x479   :  { %v1415_v6 = vld [vmem:[#allocation5 + $0x10] sm:$0xff] }
 0x47a   :  { %1153 = vst.msk [vmem:[#allocation5 + $0x18] sm:$0xff] %vm313_vm4, %v1152_v5  ;;  %1989 = vrcp.f32 %v1415_v6 }
 0x47f   :  { %v591_v8 = vpop.permute.xlu0 %590 }
 0x480   :  { %v1988_v9 = vpop.eup %1987  ;;  %v593_v10 = vmul.f32 %v591_v8, %v587_v7 }
 0x481   :  { %1262 = vperm.xlu1 %1967, %v1988_v9   ;;  %v1501_v11 = vld [vmem:[#allocation5 + $0x18] sm:$0xff] }
 0x482   :  { %v670_v12 = vadd.f32 %v666_v46, %v593_v10  ;;  %1991 = vrcp.f32 %v1501_v11  ;;  %v1510_v46 = vld [vmem:[#allocation18 + $0x30] sm:$0xff] }
 0x483   :  { %v1940_v50 = vpack.c.bf16 %v1511_v47, %v1510_v46 }
 0x484   :  { %v1990_v13 = vpop.eup %1989  ;;  %671 = vst.msk [vmem:[#allocation3] sm:$0xff] %vm308_vm2, %v670_v12 }
 0x485   :  { %968 = vperm.xlu1 %1967, %v1984_v55   ;;  %1420 = vperm.xlu0 %1968, %v1990_v13  }
 0x489   :  { %1158 = vperm.xlu1 %1967, %v1986_v62  }
 0x48b   :  { %v1244_v40 = vld [vmem:[#allocation3] sm:$0xff] }
 0x48c   :  { %v1992_v14 = vpop.eup %1991 }
 0x48d   :  { %1506 = vperm.xlu1 %1967, %v1992_v14  }
 0x48f   :  { %v1251_v37 = vpop.permute.xlu0 %1250 }
 0x490   :  { %v1253_v43 = vmul.f32 %v1251_v37, %v1244_v40 }
 0x4b0   :  { %v856_v19 = vpop.f32.mrb[8].mxu1 }
 0x4b1   :  { %v860_v20 = vadd.f32 %v856_v19, %v783_v18  ;;  %v1852_v21 = vpop.f32.mrb[9].mxu1 }
 0x4b3   :  { %861 = vst.msk [vmem:[#allocation3 + $0x8] sm:$0xff] %vm308_vm2, %v860_v20 }
 0x4b4   :  { %v1044_v22 = vpop.f32.mrb[10].mxu1 }
 0x4b5   :  { %v1862_v23 = vpop.f32.mrb[11].mxu1 }
 0x4ba   :  { %v1256_v29 = vld [vmem:[#allocation3 + $0x8] sm:$0xff] }
 0x4bc   :  { %v1234_v24 = vpop.f32.mrb[12].mxu1 }
 0x4bd   :  { %v1872_v25 = vpop.f32.mrb[13].mxu1 }
 0x500   :  { %v1263_v28 = vpop.permute.xlu1 %1262 }
 0x501   :  { %v1265_v31 = vmul.f32 %v1263_v28, %v1256_v29 }
 0x503   :  { %1878 = vmatmul.mubr.msk.f32.vlgmr.msra.gmra.mrb[10].mxu0 %vm308_vm2, %v1265_v31 }
 0x504   :  { %1935 = vmatpush3.bf16.msra.mxu0 %v1934_v30  ;;  %v969_v33 = vpop.permute.xlu1 %968  ;;  %1884 = vmatprep.mubr.msk.f32.mxu0 %vm2218_vm0, %v2219_v1  ;;  %v1421_v48 = vpop.permute.xlu0 %1420 }
 0x505   :  { %v971_v34 = vmul.f32 %v969_v33, %v965_v32  ;;  %1936 = vmatprep.subr.bf16.mxu0 %v2217_v0 }
 0x507   :  { %v1048_v39 = vadd.f32 %v1044_v22, %v971_v34 }
 0x508   :  { %v1159_v41 = vpop.permute.xlu1 %1158 }
 0x509   :  { %1049 = vst.msk [vmem:[#allocation3 + $0x10] sm:$0xff] %vm308_vm2, %v1048_v39  ;;  %v1161_v44 = vmul.f32 %v1159_v41, %v1155_v38 }
 0x50b   :  { %v1238_v45 = vadd.f32 %v1234_v24, %v1161_v44  ;;  %1885 = vmatmul.mubr.msk.f32.vlgmr.msra.gmra.mrb[10].mxu0 %vm308_vm2, %v1253_v43 }
 0x50c   :  { %1938 = vmatpush3.bf16.msra.mxu0 %v1937_v42  ;;  %1891 = vmatprep.mubr.msk.f32.mxu0 %vm2218_vm0, %v2219_v1  ;;  %v1507_v53 = vpop.permute.xlu1 %1506 }
 0x50d   :  { %1239 = vst.msk [vmem:[#allocation3 + $0x18] sm:$0xff] %vm308_vm2, %v1238_v45  ;;  %1939 = vmatprep.subr.bf16.mxu0 %v2217_v0 }
 0x510   :  { %v1414_v49 = vld [vmem:[#allocation3 + $0x10] sm:$0xff] }
 0x511   :  { %v1423_v51 = vmul.f32 %v1421_v48, %v1414_v49 }
 0x513   :  { %1892 = vmatmul.mubr.msk.f32.vlgmr.msra.gmra.mrb[10].mxu0 %vm308_vm2, %v1423_v51 }
 0x514   :  { %1941 = vmatpush3.bf16.msra.mxu0 %v1940_v50  ;;  %1898 = vmatprep.mubr.msk.f32.mxu0 %vm2218_vm0, %v2219_v1  ;;  %v1500_v52 = vld [vmem:[#allocation3 + $0x18] sm:$0xff] }
 0x515   :  { %v1509_v54 = vmul.f32 %v1507_v53, %v1500_v52 }
 0x51b   :  { %1899 = vmatmul.mubr.msk.f32.vlgmr.msra.gmra.mrb[10].mxu0 %vm308_vm2, %v1509_v54 }
 0x5ee   :  { %v1581_v55 = vpop.f32.mrb[10].mxu0 }
 0x5ef   :  { %1587 = vst.msk [vmem:[#allocation20] sm:$0xff] %vm1586_vm5, %v1581_v55  ;;  %v1900_v0 = vpop.f32.mrb[11].mxu0  ;;  %1904 = vmatmul.mubr.msk.f32.vlgmr.msra.gmra.mrb[14].mxu1 %vm1586_vm5, %v1581_v55  ;;  %v1665_v56 = vmul.f32 %v1581_v55, %v1581_v55 }
 0x5f1   :  { %v1666_v57 = vsel %vm1586_vm5, %v1665_v56, 0.0 }
 0x5f2   :  { %1667 = vadd.xlane.f32.xlu0 %v1666_v57 }
 0x67f   :  { %v1668_v1 = vpop.xlane.xlu0 %1667 }
 0x680   :  { %v1676_v60 = vadd.f32 %v1738_v58, %v1668_v1 }
 0x6c2   :  { %v1661_v59 = vpop.f32.mrb[14].mxu1 }
 0x6c3   :  { %v1677_v61 = vmul.f32 2.0, %v1661_v59  ;;  %v1905_v62 = vpop.f32.mrb[15].mxu1 }
 0x6c5   :  { %v1678_v63 = vsub.f32 %v1676_v60, %v1677_v61 }
 0x6c7   :  { %v1679_v2 = vmax.f32 %v1678_v63, 0.0 }
 0x6c9   :  { %v1680_v3 = vadd.f32 1.0, %v1679_v2 }
 0x6cb   :  { %v1681_v4 = vadd.f32 1e-08, %v1680_v3 }
 0x6cd   :  { %1993 = vrcp.f32 %v1681_v4 }
 0x6d7   :  { %v1994_v5 = vpop.eup %1993 }
 0x6d8   :  { %v1684_v6 = vmul.f32 %v1994_v5, %v1994_v5 }
 0x6da   :  { %v1685_v7 = vmul.f32 0.5, %v1684_v6 }
 0x6dc   :  { %v1687_v8 = vsel %vm1686_vm6, %v1685_v7, 0.0 }
 0x6dd   :  { %1688 = vadd.xlane.f32.xlu1 %v1687_v8 }
 0x6de   :  { %2184 = shalt.err (!%p2181_p12)
}
 0x6df   :  { %s2185_s28 = scalar_lea.hbm %s2638_s11, 128 }
 0x6e0   :  { %p2186_p13 = scmp.ne.s32.totalorder %s2638_s11, %s2185_s28  ;;  %p2189_p0 = scmp.lt.u32.totalorder %s2185_s28, %s2638_s11 }
 0x6e2   :  { %p2191_p1 = pnand %p2189_p0, %p2186_p13 }
 0x6e4   :  { %2194 = shalt.err (!%p2191_p1)
}
 0x6e5   :  { %1702 = dma.vmem_to_hbm [thread:$0]  %s1700_s27, 128, %s2638_s11, [#allocation8]  }
 0x76a   :  { %v1689_v9 = vpop.xlane.xlu1 %1688 }
 0x76b   :  { %1995 = vrcp.f32 %v1689_v9 }
 0x775   :  { %v1996_v10 = vpop.eup %1995 }
 0x776   :  { %v1691_v11 = vmul.f32 %v1996_v10, %v1685_v7 }
 0x778   :  { %1692 = vst.msk [vmem:[%s2639_s12] sm:$0xff] %vm1686_vm6, %v1691_v11 }
 0x779   :  { %2205 = dma.done.wait [#allocation8], 128  }
 0x77a   :  { %2206 = vsyncadd [#allocation8], 4294967168 }
 0x77b   :  { %1710 = vsyncpa [#allocation7], 1 }
 0x77c   :  { %1711 = vsyncpa [#allocation10], 1 }
 0x77d   :  { %1712 = vsyncpa [#allocation13], 1 }
 0x77e   :  { %1713 = vsyncpa [#allocation16], 1 }
 0x77f   :  { %1714 = vsyncpa [#allocation19], 1 }
 0x780   :  { %1715 = vsyncpa [#allocation8], 1 }

</bundles_post_ra>
